<compile_context>
chip_gen: v7x
topology: tpu7x:2x2x1
jax: 0.10.0
libtpu: 0.0.40
codegen_flags: <defaults>
</compile_context>

<pallas_src>
import functools

import jax
import jax.numpy as jnp
import numpy as np
from jax.experimental import pallas as pl
from jax.experimental.pallas import tpu as pltpu


# --------------------------- static descriptors ------------------------------
def _build_width_select(w_in, w_out):
    """(W_in, 3*W_out) 0/1 matrix folding nearest width-upsample, the conv's
    zero padding and the three kx taps.

    bcat[w, kx*W_out + x] == 1 iff padded-upsampled column (x + kx) is a real
    (non-pad) column whose nearest source column is w.
    """
    m = np.zeros((w_in, 3, w_out), np.float32)
    for kx in range(3):
        for x in range(w_out):
            col = x + kx                       # column in padded upsampled image
            if 1 <= col <= w_out:
                m[((col - 1) * w_in) // w_out, kx, x] = 1.0
    return m.reshape(w_in, 3 * w_out)


def _build_row_map(h_in, h_out):
    """row_map[j] = nearest source row of padded-upsampled row j, or H_in (the
    all-zero scratch row) for the two zero-padding rows."""
    rm = np.full((h_out + 2,), h_in, np.int32)
    for j in range(1, h_out + 1):
        rm[j] = ((j - 1) * h_in) // h_out
    return rm


def _pick_tile_rows(h_out, w_out, c_out, c3, budget_bytes=6 << 20):
    """Largest divisor TH of H_out with a lane-aligned (TH*W_out % 128 == 0)
    output block (or TH == H_out) whose per-tile buffers fit the budget."""
    def legal(d):
        return h_out % d == 0 and ((d * w_out) % 128 == 0 or d == h_out)

    best = None
    for d in range(1, h_out + 1):
        if not legal(d):
            continue
        tile_bytes = 4 * (3 * c_out * d * w_out         # out dbl-buffer + acc
                          + c3 * (d + 2) * w_out)       # row slab
        if tile_bytes <= budget_bytes and (best is None or d > best):
            best = d
    if best is None:                                    # smallest legal tile
        best = next(d for d in range(1, h_out + 1) if legal(d))
    return best


def _round_up(v, m):
    return (v + m - 1) // m * m


# --------------------------------- kernel ------------------------------------
def _upconv_kernel(row_map_ref, x_ref, bcat_ref, w3_ref, scale_ref, shift_ref,
                   o_ref, tws_ref, slab_ref):
    """One grid step = one image (axis 0) x one tile of TH output rows (axis 1).

    row_map_ref : (H_out+2,) int32 SMEM   padded-upsampled row -> source row / pad
    x_ref       : (1, H_in*C_in, W_in)    input, h-major rows (x[c,h,w] at h*C_in+c)
    bcat_ref    : (W_in, 3*W_out)         width upsample + pad + kx-fold matrix
    w3_ref      : (3, C_out, 3*C_in)      conv weights, [ky, c_out, kx*C_in + c]
    scale_ref   : (C_out, 1)              folded BN scale
    shift_ref   : (C_out, 1)              folded conv-bias + BN shift
    o_ref       : (1, C_out, TH*W_out)    lane-dense output tile
    tws_ref     : (H_in+1, 3*C_in, W_out) per-image width-stage cache (VMEM)
    slab_ref    : (3*C_in, (TH+2)*W_out)  per-tile gathered row slab (VMEM)
    """
    t = pl.program_id(1)

    c3 = w3_ref.shape[2]
    c_in = c3 // 3
    h_in = tws_ref.shape[0] - 1
    w_out = tws_ref.shape[2]
    thw = o_ref.shape[2]
    th = thw // w_out

    # ---- once per image: width upsample + pad + kx fold, one batched dot ----
    @pl.when(t == 0)
    def _():
        prod = jnp.dot(x_ref[0], bcat_ref[...],
                       preferred_element_type=jnp.float32)   # (H_in*C_in, 3*W_out)
        for h in range(h_in):
            for kx in range(3):
                tws_ref[h, kx * c_in:(kx + 1) * c_in, :] = (
                    prod[h * c_in:(h + 1) * c_in,
                         kx * w_out:(kx + 1) * w_out])
        tws_ref[h_in] = jnp.zeros((c3, w_out), jnp.float32)   # zero pad row

    # ---- gather the TH+2 distinct padded rows this tile needs (dedup) -------
    base = t * th
    for j in range(th + 2):
        hsrc = row_map_ref[base + j]                          # scalar from SMEM
        slab_ref[:, j * w_out:(j + 1) * w_out] = tws_ref[hsrc]

    # ---- 3 K-deep, N-wide MXU dots: (C_out,3C_in) x (3C_in, TH*W_out) -------
    acc = jnp.zeros((o_ref.shape[1], thw), jnp.float32)
    for ky in range(3):
        acc = acc + jnp.dot(w3_ref[ky],
                            slab_ref[:, ky * w_out: ky * w_out + thw],
                            preferred_element_type=jnp.float32)

    # ---- fused bias + BN + ReLU epilogue, single lane-dense store ------------
    y = jnp.maximum(acc * scale_ref[...] + shift_ref[...], 0.0)
    o_ref[0] = y.astype(o_ref.dtype)


# -------------------------------- wrapper ------------------------------------
@functools.partial(jax.jit, static_argnames=("size",))
def up_conv_forward(x, conv_w, conv_b, bn_gamma, bn_beta, bn_mean, bn_var,
                    size, eps=1e-5):
    """x: (N, C_in, H, W) float32  ->  (N, C_out, size[0], size[1]) float32."""
    N, C_in, H_in, W_in = x.shape
    C_out = conv_w.shape[0]
    H_out, W_out = size
    C3 = 3 * C_in

    TH = _pick_tile_rows(H_out, W_out, C_out, C3)
    T = H_out // TH

    # input as h-major rows: row h*C_in + c holds x[n, c, h, :] (small tensor)
    x_hm = jnp.transpose(x.astype(jnp.float32), (0, 2, 1, 3)).reshape(
        N, H_in * C_in, W_in)

    # conv weight (C_out, C_in, 3, 3) -> (3, C_out, 3*C_in), [ky, co, kx*C_in + c]
    w3 = jnp.transpose(conv_w.astype(jnp.float32), (2, 0, 3, 1)).reshape(
        3, C_out, C3)

    # fold conv bias + inference BatchNorm into per-channel scale/shift
    scale = (bn_gamma / jnp.sqrt(bn_var + eps)).astype(jnp.float32)
    shift = ((conv_b - bn_mean) * scale + bn_beta).astype(jnp.float32)
    scale2 = scale.reshape(C_out, 1)
    shift2 = shift.reshape(C_out, 1)

    # static upsample/pad descriptors (trace-time numpy constants)
    bcat = jnp.asarray(_build_width_select(W_in, W_out))      # (W_in, 3*W_out)
    row_map = jnp.asarray(_build_row_map(H_in, H_out))        # (H_out+2,)

    # cost estimate: main conv + width-stage dots
    flops = (2 * N * H_out * W_out * 9 * C_in * C_out
             + 2 * N * H_in * C_in * W_in * 3 * W_out)
    bytes_accessed = 4 * (N * C_in * H_in * W_in
                          + 9 * C_out * C_in
                          + N * C_out * H_out * W_out)
    cost = pl.CostEstimate(flops=int(flops), transcendentals=0,
                           bytes_accessed=int(bytes_accessed))

    # VMEM estimate (with (8,128) tile padding) and generation-aware clamp
    est = 4 * (
        2 * _round_up(H_in * C_in, 8) * _round_up(W_in, 128)       # x block x2
        + 2 * _round_up(W_in, 8) * _round_up(3 * W_out, 128)       # bcat x2
        + 2 * 3 * _round_up(C_out, 8) * _round_up(C3, 128)         # w3 x2
        + 2 * _round_up(C_out, 8) * _round_up(TH * W_out, 128)     # out block x2
        + (H_in + 1) * _round_up(C3, 8) * _round_up(W_out, 128)    # tws scratch
        + _round_up(C3, 8) * _round_up((TH + 2) * W_out, 128)      # row slab
        + _round_up(C_out, 8) * _round_up(TH * W_out, 128)         # acc value
    )
    try:
        phys_vmem = int(pltpu.get_tpu_info().vmem_capacity_bytes)
    except Exception:
        phys_vmem = 64 << 20                     # conservative (v7x physical)
    vmem_cap = phys_vmem * 7 // 8                # keep double-buffer headroom
    vmem_limit = int(min(vmem_cap, max(32 << 20, est + (8 << 20))))

    out_flat = pl.pallas_call(
        _upconv_kernel,
        out_shape=jax.ShapeDtypeStruct((N, C_out, H_out * W_out), jnp.float32),
        grid_spec=pltpu.PrefetchScalarGridSpec(
            num_scalar_prefetch=1,
            grid=(N, T),
            in_specs=[
                pl.BlockSpec((1, H_in * C_in, W_in),
                             lambda n, t, rm: (n, 0, 0)),
                pl.BlockSpec((W_in, 3 * W_out), lambda n, t, rm: (0, 0)),
                pl.BlockSpec((3, C_out, C3), lambda n, t, rm: (0, 0, 0)),
                pl.BlockSpec((C_out, 1), lambda n, t, rm: (0, 0)),
                pl.BlockSpec((C_out, 1), lambda n, t, rm: (0, 0)),
            ],
            out_specs=pl.BlockSpec((1, C_out, TH * W_out),
                                   lambda n, t, rm: (n, 0, t)),
            scratch_shapes=[
                pltpu.VMEM((H_in + 1, C3, W_out), jnp.float32),
                pltpu.VMEM((C3, (TH + 2) * W_out), jnp.float32),
            ],
        ),
        compiler_params=pltpu.CompilerParams(
            dimension_semantics=("parallel", "arbitrary"),
            vmem_limit_bytes=vmem_limit),
        cost_estimate=cost,
    )(row_map, x_hm, bcat, w3, scale2, shift2)

    return out_flat.reshape(N, C_out, H_out, W_out)


# ----------------------------- reference ------------------------------------
def _nearest_upsample_nchw(x, size):
    """PyTorch nn.Upsample(size=size, mode='nearest') on NCHW input."""
    N, C, H_in, W_in = x.shape
    H_out, W_out = size
    idx_h = (jnp.arange(H_out) * H_in) // H_out
    idx_w = (jnp.arange(W_out) * W_in) // W_out
    return x[:, :, idx_h[:, None], idx_w[None, :]]


def _reference(x, conv_w, conv_b, bn_gamma, bn_beta, bn_mean, bn_var, size,
               eps=1e-5):
    x_up = _nearest_upsample_nchw(x, size)
    y = jax.lax.conv_general_dilated(
        x_up, conv_w, window_strides=(1, 1), padding=((1, 1), (1, 1)),
        dimension_numbers=("NCHW", "OIHW", "NCHW"))
    y = y + conv_b[None, :, None, None]
    y = (y - bn_mean[None, :, None, None]) / jnp.sqrt(
        bn_var[None, :, None, None] + eps)
    y = y * bn_gamma[None, :, None, None] + bn_beta[None, :, None, None]
    return jnp.maximum(y, 0.0)


if __name__ == "__main__":
    # Small shapes: batch=2, in_ch=4, out_ch=8, spatial 8x8 upsampled to 16x16.
    N, C_in, C_out = 2, 4, 8
    H_in, W_in = 8, 8
    size = (16, 16)

    key = jax.random.PRNGKey(0)
    kx, kw, kb = jax.random.split(key, 3)

    x = jax.random.normal(kx, (N, C_in, H_in, W_in), dtype=jnp.float32)

    # Deterministic parameter init (synthetic; nn.Conv2d / nn.BatchNorm2d shapes).
    conv_w = jax.random.normal(kw, (C_out, C_in, 3, 3), dtype=jnp.float32) * 0.1
    conv_b = jax.random.normal(kb, (C_out,), dtype=jnp.float32) * 0.1
    bn_gamma = jnp.ones((C_out,), jnp.float32)
    bn_beta = jnp.zeros((C_out,), jnp.float32)
    bn_mean = jnp.zeros((C_out,), jnp.float32)
    bn_var = jnp.ones((C_out,), jnp.float32)

    out = up_conv_forward(x, conv_w, conv_b, bn_gamma, bn_beta,
                          bn_mean, bn_var, size=size)
    out = jax.block_until_ready(out)

    ref = _reference(x, conv_w, conv_b, bn_gamma, bn_beta, bn_mean, bn_var,
                     size)
    assert out.shape == (N, C_out, size[0], size[1])
    assert jnp.allclose(out, ref, atol=1e-3, rtol=1e-3)

    print("KERNEL_OK")
</pallas_src>

<mosaic_0001>
module attributes {stable_mosaic.version = 11 : i64} {
  func.func @_upconv_kernel(%arg0: i32, %arg1: i32, %arg2: memref<18xi32, #tpu.memory_space<smem>>, %arg3: memref<1x32x8xf32, #tpu.memory_space<vmem>>, %arg4: memref<8x48xf32, #tpu.memory_space<vmem>>, %arg5: memref<3x8x12xf32, #tpu.memory_space<vmem>>, %arg6: memref<8x1xf32, #tpu.memory_space<vmem>>, %arg7: memref<8x1xf32, #tpu.memory_space<vmem>>, %arg8: memref<1x8x256xf32, #tpu.memory_space<vmem>>, %arg9: memref<9x12x16xf32, #tpu.memory_space<vmem>>, %arg10: memref<12x288xf32, #tpu.memory_space<vmem>>) attributes {dimension_semantics = [#tpu.dimension_semantics<parallel>, #tpu.dimension_semantics<arbitrary>], iteration_bounds = array<i64: 2, 1>, scalar_prefetch = 1 : i64, scratch_operands = 2 : i64, tpu.core_type = #tpu.core_type<tc>, window_params = [{transform_indices = @transform_0, window_bounds = array<i64: 1, 32, 8>}, {pipeline_mode = #tpu.pipeline_mode<synchronous>, transform_indices = @transform_1, window_bounds = array<i64: 8, 48>}, {pipeline_mode = #tpu.pipeline_mode<synchronous>, transform_indices = @transform_2, window_bounds = array<i64: 3, 8, 12>}, {pipeline_mode = #tpu.pipeline_mode<synchronous>, transform_indices = @transform_3, window_bounds = array<i64: 8, 1>}, {pipeline_mode = #tpu.pipeline_mode<synchronous>, transform_indices = @transform_4, window_bounds = array<i64: 8, 1>}, {transform_indices = @transform_5, window_bounds = array<i64: 1, 8, 256>}]} {
    %c0_i32 = arith.constant 0 : i32
    %0 = arith.cmpi eq, %arg1, %c0_i32 : i32
    %1 = arith.extui %0 : i1 to i32
    %c0_i32_0 = arith.constant 0 : i32
    %2 = arith.cmpi ne, %1, %c0_i32_0 : i32
    scf.if %2 {
      %c0_81 = arith.constant 0 : index
      %c0_82 = arith.constant 0 : index
      %c0_83 = arith.constant 0 : index
      %157 = vector.load %arg3[%c0_81, %c0_82, %c0_83] : memref<1x32x8xf32, #tpu.memory_space<vmem>>, vector<1x32x8xf32>
      %158 = vector.shape_cast %157 : vector<1x32x8xf32> to vector<32x8xf32>
      %c0_84 = arith.constant 0 : index
      %c0_85 = arith.constant 0 : index
      %159 = vector.load %arg4[%c0_84, %c0_85] : memref<8x48xf32, #tpu.memory_space<vmem>>, vector<8x48xf32>
      %cst_86 = arith.constant dense<0.000000e+00> : vector<32x48xf32>
      %160 = tpu.matmul %158, %159, %cst_86 {dimension_numbers = #tpu.dot_dimension_numbers<[1], [0], [0], [1], [0, 0, 1, 1], [], []>} : vector<32x8xf32>, vector<8x48xf32>, vector<32x48xf32> -> vector<32x48xf32>
      %161 = vector.extract_strided_slice %160 {offsets = [0, 0], sizes = [4, 16], strides = [1, 1]} : vector<32x48xf32> to vector<4x16xf32>
      %c0_87 = arith.constant 0 : index
      %c0_88 = arith.constant 0 : index
      %c0_89 = arith.constant 0 : index
      %162 = vector.load %arg9[%c0_87, %c0_88, %c0_89] : memref<9x12x16xf32, #tpu.memory_space<vmem>>, vector<1x4x16xf32>
      %163 = vector.shape_cast %162 : vector<1x4x16xf32> to vector<4x16xf32>
      %164 = vector.shape_cast %161 : vector<4x16xf32> to vector<1x4x16xf32>
      tpu.vector_store %arg9[%c0_87, %c0_88, %c0_89], %164 {strides = array<i32>} : memref<9x12x16xf32, #tpu.memory_space<vmem>>, vector<1x4x16xf32>,
      %165 = vector.extract_strided_slice %160 {offsets = [0, 16], sizes = [4, 16], strides = [1, 1]} : vector<32x48xf32> to vector<4x16xf32>
      %c0_90 = arith.constant 0 : index
      %c4 = arith.constant 4 : index
      %c0_91 = arith.constant 0 : index
      %166 = vector.load %arg9[%c0_90, %c4, %c0_91] : memref<9x12x16xf32, #tpu.memory_space<vmem>>, vector<1x4x16xf32>
      %167 = vector.shape_cast %166 : vector<1x4x16xf32> to vector<4x16xf32>
      %168 = vector.shape_cast %165 : vector<4x16xf32> to vector<1x4x16xf32>
      tpu.vector_store %arg9[%c0_90, %c4, %c0_91], %168 {strides = array<i32>} : memref<9x12x16xf32, #tpu.memory_space<vmem>>, vector<1x4x16xf32>,
      %169 = vector.extract_strided_slice %160 {offsets = [0, 32], sizes = [4, 16], strides = [1, 1]} : vector<32x48xf32> to vector<4x16xf32>
      %c0_92 = arith.constant 0 : index
      %c8 = arith.constant 8 : index
      %c0_93 = arith.constant 0 : index
      %170 = vector.load %arg9[%c0_92, %c8, %c0_93] : memref<9x12x16xf32, #tpu.memory_space<vmem>>, vector<1x4x16xf32>
      %171 = vector.shape_cast %170 : vector<1x4x16xf32> to vector<4x16xf32>
      %172 = vector.shape_cast %169 : vector<4x16xf32> to vector<1x4x16xf32>
      tpu.vector_store %arg9[%c0_92, %c8, %c0_93], %172 {strides = array<i32>} : memref<9x12x16xf32, #tpu.memory_space<vmem>>, vector<1x4x16xf32>,
      %173 = vector.extract_strided_slice %160 {offsets = [4, 0], sizes = [4, 16], strides = [1, 1]} : vector<32x48xf32> to vector<4x16xf32>
      %c1_94 = arith.constant 1 : index
      %c0_95 = arith.constant 0 : index
      %c0_96 = arith.constant 0 : index
      %174 = vector.load %arg9[%c1_94, %c0_95, %c0_96] : memref<9x12x16xf32, #tpu.memory_space<vmem>>, vector<1x4x16xf32>
      %175 = vector.shape_cast %174 : vector<1x4x16xf32> to vector<4x16xf32>
      %176 = vector.shape_cast %173 : vector<4x16xf32> to vector<1x4x16xf32>
      tpu.vector_store %arg9[%c1_94, %c0_95, %c0_96], %176 {strides = array<i32>} : memref<9x12x16xf32, #tpu.memory_space<vmem>>, vector<1x4x16xf32>,
      %177 = vector.extract_strided_slice %160 {offsets = [4, 16], sizes = [4, 16], strides = [1, 1]} : vector<32x48xf32> to vector<4x16xf32>
      %c1_97 = arith.constant 1 : index
      %c4_98 = arith.constant 4 : index
      %c0_99 = arith.constant 0 : index
      %178 = vector.load %arg9[%c1_97, %c4_98, %c0_99] : memref<9x12x16xf32, #tpu.memory_space<vmem>>, vector<1x4x16xf32>
      %179 = vector.shape_cast %178 : vector<1x4x16xf32> to vector<4x16xf32>
      %180 = vector.shape_cast %177 : vector<4x16xf32> to vector<1x4x16xf32>
      tpu.vector_store %arg9[%c1_97, %c4_98, %c0_99], %180 {strides = array<i32>} : memref<9x12x16xf32, #tpu.memory_space<vmem>>, vector<1x4x16xf32>,
      %181 = vector.extract_strided_slice %160 {offsets = [4, 32], sizes = [4, 16], strides = [1, 1]} : vector<32x48xf32> to vector<4x16xf32>
      %c1_100 = arith.constant 1 : index
      %c8_101 = arith.constant 8 : index
      %c0_102 = arith.constant 0 : index
      %182 = vector.load %arg9[%c1_100, %c8_101, %c0_102] : memref<9x12x16xf32, #tpu.memory_space<vmem>>, vector<1x4x16xf32>
      %183 = vector.shape_cast %182 : vector<1x4x16xf32> to vector<4x16xf32>
      %184 = vector.shape_cast %181 : vector<4x16xf32> to vector<1x4x16xf32>
      tpu.vector_store %arg9[%c1_100, %c8_101, %c0_102], %184 {strides = array<i32>} : memref<9x12x16xf32, #tpu.memory_space<vmem>>, vector<1x4x16xf32>,
      %185 = vector.extract_strided_slice %160 {offsets = [8, 0], sizes = [4, 16], strides = [1, 1]} : vector<32x48xf32> to vector<4x16xf32>
      %c2_103 = arith.constant 2 : index
      %c0_104 = arith.constant 0 : index
      %c0_105 = arith.constant 0 : index
      %186 = vector.load %arg9[%c2_103, %c0_104, %c0_105] : memref<9x12x16xf32, #tpu.memory_space<vmem>>, vector<1x4x16xf32>
      %187 = vector.shape_cast %186 : vector<1x4x16xf32> to vector<4x16xf32>
      %188 = vector.shape_cast %185 : vector<4x16xf32> to vector<1x4x16xf32>
      tpu.vector_store %arg9[%c2_103, %c0_104, %c0_105], %188 {strides = array<i32>} : memref<9x12x16xf32, #tpu.memory_space<vmem>>, vector<1x4x16xf32>,
      %189 = vector.extract_strided_slice %160 {offsets = [8, 16], sizes = [4, 16], strides = [1, 1]} : vector<32x48xf32> to vector<4x16xf32>
      %c2_106 = arith.constant 2 : index
      %c4_107 = arith.constant 4 : index
      %c0_108 = arith.constant 0 : index
      %190 = vector.load %arg9[%c2_106, %c4_107, %c0_108] : memref<9x12x16xf32, #tpu.memory_space<vmem>>, vector<1x4x16xf32>
      %191 = vector.shape_cast %190 : vector<1x4x16xf32> to vector<4x16xf32>
      %192 = vector.shape_cast %189 : vector<4x16xf32> to vector<1x4x16xf32>
      tpu.vector_store %arg9[%c2_106, %c4_107, %c0_108], %192 {strides = array<i32>} : memref<9x12x16xf32, #tpu.memory_space<vmem>>, vector<1x4x16xf32>,
      %193 = vector.extract_strided_slice %160 {offsets = [8, 32], sizes = [4, 16], strides = [1, 1]} : vector<32x48xf32> to vector<4x16xf32>
      %c2_109 = arith.constant 2 : index
      %c8_110 = arith.constant 8 : index
      %c0_111 = arith.constant 0 : index
      %194 = vector.load %arg9[%c2_109, %c8_110, %c0_111] : memref<9x12x16xf32, #tpu.memory_space<vmem>>, vector<1x4x16xf32>
      %195 = vector.shape_cast %194 : vector<1x4x16xf32> to vector<4x16xf32>
      %196 = vector.shape_cast %193 : vector<4x16xf32> to vector<1x4x16xf32>
      tpu.vector_store %arg9[%c2_109, %c8_110, %c0_111], %196 {strides = array<i32>} : memref<9x12x16xf32, #tpu.memory_space<vmem>>, vector<1x4x16xf32>,
      %197 = vector.extract_strided_slice %160 {offsets = [12, 0], sizes = [4, 16], strides = [1, 1]} : vector<32x48xf32> to vector<4x16xf32>
      %c3 = arith.constant 3 : index
      %c0_112 = arith.constant 0 : index
      %c0_113 = arith.constant 0 : index
      %198 = vector.load %arg9[%c3, %c0_112, %c0_113] : memref<9x12x16xf32, #tpu.memory_space<vmem>>, vector<1x4x16xf32>
      %199 = vector.shape_cast %198 : vector<1x4x16xf32> to vector<4x16xf32>
      %200 = vector.shape_cast %197 : vector<4x16xf32> to vector<1x4x16xf32>
      tpu.vector_store %arg9[%c3, %c0_112, %c0_113], %200 {strides = array<i32>} : memref<9x12x16xf32, #tpu.memory_space<vmem>>, vector<1x4x16xf32>,
      %201 = vector.extract_strided_slice %160 {offsets = [12, 16], sizes = [4, 16], strides = [1, 1]} : vector<32x48xf32> to vector<4x16xf32>
      %c3_114 = arith.constant 3 : index
      %c4_115 = arith.constant 4 : index
      %c0_116 = arith.constant 0 : index
      %202 = vector.load %arg9[%c3_114, %c4_115, %c0_116] : memref<9x12x16xf32, #tpu.memory_space<vmem>>, vector<1x4x16xf32>
      %203 = vector.shape_cast %202 : vector<1x4x16xf32> to vector<4x16xf32>
      %204 = vector.shape_cast %201 : vector<4x16xf32> to vector<1x4x16xf32>
      tpu.vector_store %arg9[%c3_114, %c4_115, %c0_116], %204 {strides = array<i32>} : memref<9x12x16xf32, #tpu.memory_space<vmem>>, vector<1x4x16xf32>,
      %205 = vector.extract_strided_slice %160 {offsets = [12, 32], sizes = [4, 16], strides = [1, 1]} : vector<32x48xf32> to vector<4x16xf32>
      %c3_117 = arith.constant 3 : index
      %c8_118 = arith.constant 8 : index
      %c0_119 = arith.constant 0 : index
      %206 = vector.load %arg9[%c3_117, %c8_118, %c0_119] : memref<9x12x16xf32, #tpu.memory_space<vmem>>, vector<1x4x16xf32>
      %207 = vector.shape_cast %206 : vector<1x4x16xf32> to vector<4x16xf32>
      %208 = vector.shape_cast %205 : vector<4x16xf32> to vector<1x4x16xf32>
      tpu.vector_store %arg9[%c3_117, %c8_118, %c0_119], %208 {strides = array<i32>} : memref<9x12x16xf32, #tpu.memory_space<vmem>>, vector<1x4x16xf32>,
      %209 = vector.extract_strided_slice %160 {offsets = [16, 0], sizes = [4, 16], strides = [1, 1]} : vector<32x48xf32> to vector<4x16xf32>
      %c4_120 = arith.constant 4 : index
      %c0_121 = arith.constant 0 : index
      %c0_122 = arith.constant 0 : index
      %210 = vector.load %arg9[%c4_120, %c0_121, %c0_122] : memref<9x12x16xf32, #tpu.memory_space<vmem>>, vector<1x4x16xf32>
      %211 = vector.shape_cast %210 : vector<1x4x16xf32> to vector<4x16xf32>
      %212 = vector.shape_cast %209 : vector<4x16xf32> to vector<1x4x16xf32>
      tpu.vector_store %arg9[%c4_120, %c0_121, %c0_122], %212 {strides = array<i32>} : memref<9x12x16xf32, #tpu.memory_space<vmem>>, vector<1x4x16xf32>,
      %213 = vector.extract_strided_slice %160 {offsets = [16, 16], sizes = [4, 16], strides = [1, 1]} : vector<32x48xf32> to vector<4x16xf32>
      %c4_123 = arith.constant 4 : index
      %c4_124 = arith.constant 4 : index
      %c0_125 = arith.constant 0 : index
      %214 = vector.load %arg9[%c4_123, %c4_124, %c0_125] : memref<9x12x16xf32, #tpu.memory_space<vmem>>, vector<1x4x16xf32>
      %215 = vector.shape_cast %214 : vector<1x4x16xf32> to vector<4x16xf32>
      %216 = vector.shape_cast %213 : vector<4x16xf32> to vector<1x4x16xf32>
      tpu.vector_store %arg9[%c4_123, %c4_124, %c0_125], %216 {strides = array<i32>} : memref<9x12x16xf32, #tpu.memory_space<vmem>>, vector<1x4x16xf32>,
      %217 = vector.extract_strided_slice %160 {offsets = [16, 32], sizes = [4, 16], strides = [1, 1]} : vector<32x48xf32> to vector<4x16xf32>
      %c4_126 = arith.constant 4 : index
      %c8_127 = arith.constant 8 : index
      %c0_128 = arith.constant 0 : index
      %218 = vector.load %arg9[%c4_126, %c8_127, %c0_128] : memref<9x12x16xf32, #tpu.memory_space<vmem>>, vector<1x4x16xf32>
      %219 = vector.shape_cast %218 : vector<1x4x16xf32> to vector<4x16xf32>
      %220 = vector.shape_cast %217 : vector<4x16xf32> to vector<1x4x16xf32>
      tpu.vector_store %arg9[%c4_126, %c8_127, %c0_128], %220 {strides = array<i32>} : memref<9x12x16xf32, #tpu.memory_space<vmem>>, vector<1x4x16xf32>,
      %221 = vector.extract_strided_slice %160 {offsets = [20, 0], sizes = [4, 16], strides = [1, 1]} : vector<32x48xf32> to vector<4x16xf32>
      %c5 = arith.constant 5 : index
      %c0_129 = arith.constant 0 : index
      %c0_130 = arith.constant 0 : index
      %222 = vector.load %arg9[%c5, %c0_129, %c0_130] : memref<9x12x16xf32, #tpu.memory_space<vmem>>, vector<1x4x16xf32>
      %223 = vector.shape_cast %222 : vector<1x4x16xf32> to vector<4x16xf32>
      %224 = vector.shape_cast %221 : vector<4x16xf32> to vector<1x4x16xf32>
      tpu.vector_store %arg9[%c5, %c0_129, %c0_130], %224 {strides = array<i32>} : memref<9x12x16xf32, #tpu.memory_space<vmem>>, vector<1x4x16xf32>,
      %225 = vector.extract_strided_slice %160 {offsets = [20, 16], sizes = [4, 16], strides = [1, 1]} : vector<32x48xf32> to vector<4x16xf32>
      %c5_131 = arith.constant 5 : index
      %c4_132 = arith.constant 4 : index
      %c0_133 = arith.constant 0 : index
      %226 = vector.load %arg9[%c5_131, %c4_132, %c0_133] : memref<9x12x16xf32, #tpu.memory_space<vmem>>, vector<1x4x16xf32>
      %227 = vector.shape_cast %226 : vector<1x4x16xf32> to vector<4x16xf32>
      %228 = vector.shape_cast %225 : vector<4x16xf32> to vector<1x4x16xf32>
      tpu.vector_store %arg9[%c5_131, %c4_132, %c0_133], %228 {strides = array<i32>} : memref<9x12x16xf32, #tpu.memory_space<vmem>>, vector<1x4x16xf32>,
      %229 = vector.extract_strided_slice %160 {offsets = [20, 32], sizes = [4, 16], strides = [1, 1]} : vector<32x48xf32> to vector<4x16xf32>
      %c5_134 = arith.constant 5 : index
      %c8_135 = arith.constant 8 : index
      %c0_136 = arith.constant 0 : index
      %230 = vector.load %arg9[%c5_134, %c8_135, %c0_136] : memref<9x12x16xf32, #tpu.memory_space<vmem>>, vector<1x4x16xf32>
      %231 = vector.shape_cast %230 : vector<1x4x16xf32> to vector<4x16xf32>
      %232 = vector.shape_cast %229 : vector<4x16xf32> to vector<1x4x16xf32>
      tpu.vector_store %arg9[%c5_134, %c8_135, %c0_136], %232 {strides = array<i32>} : memref<9x12x16xf32, #tpu.memory_space<vmem>>, vector<1x4x16xf32>,
      %233 = vector.extract_strided_slice %160 {offsets = [24, 0], sizes = [4, 16], strides = [1, 1]} : vector<32x48xf32> to vector<4x16xf32>
      %c6 = arith.constant 6 : index
      %c0_137 = arith.constant 0 : index
      %c0_138 = arith.constant 0 : index
      %234 = vector.load %arg9[%c6, %c0_137, %c0_138] : memref<9x12x16xf32, #tpu.memory_space<vmem>>, vector<1x4x16xf32>
      %235 = vector.shape_cast %234 : vector<1x4x16xf32> to vector<4x16xf32>
      %236 = vector.shape_cast %233 : vector<4x16xf32> to vector<1x4x16xf32>
      tpu.vector_store %arg9[%c6, %c0_137, %c0_138], %236 {strides = array<i32>} : memref<9x12x16xf32, #tpu.memory_space<vmem>>, vector<1x4x16xf32>,
      %237 = vector.extract_strided_slice %160 {offsets = [24, 16], sizes = [4, 16], strides = [1, 1]} : vector<32x48xf32> to vector<4x16xf32>
      %c6_139 = arith.constant 6 : index
      %c4_140 = arith.constant 4 : index
      %c0_141 = arith.constant 0 : index
      %238 = vector.load %arg9[%c6_139, %c4_140, %c0_141] : memref<9x12x16xf32, #tpu.memory_space<vmem>>, vector<1x4x16xf32>
      %239 = vector.shape_cast %238 : vector<1x4x16xf32> to vector<4x16xf32>
      %240 = vector.shape_cast %237 : vector<4x16xf32> to vector<1x4x16xf32>
      tpu.vector_store %arg9[%c6_139, %c4_140, %c0_141], %240 {strides = array<i32>} : memref<9x12x16xf32, #tpu.memory_space<vmem>>, vector<1x4x16xf32>,
      %241 = vector.extract_strided_slice %160 {offsets = [24, 32], sizes = [4, 16], strides = [1, 1]} : vector<32x48xf32> to vector<4x16xf32>
      %c6_142 = arith.constant 6 : index
      %c8_143 = arith.constant 8 : index
      %c0_144 = arith.constant 0 : index
      %242 = vector.load %arg9[%c6_142, %c8_143, %c0_144] : memref<9x12x16xf32, #tpu.memory_space<vmem>>, vector<1x4x16xf32>
      %243 = vector.shape_cast %242 : vector<1x4x16xf32> to vector<4x16xf32>
      %244 = vector.shape_cast %241 : vector<4x16xf32> to vector<1x4x16xf32>
      tpu.vector_store %arg9[%c6_142, %c8_143, %c0_144], %244 {strides = array<i32>} : memref<9x12x16xf32, #tpu.memory_space<vmem>>, vector<1x4x16xf32>,
      %245 = vector.extract_strided_slice %160 {offsets = [28, 0], sizes = [4, 16], strides = [1, 1]} : vector<32x48xf32> to vector<4x16xf32>
      %c7 = arith.constant 7 : index
      %c0_145 = arith.constant 0 : index
      %c0_146 = arith.constant 0 : index
      %246 = vector.load %arg9[%c7, %c0_145, %c0_146] : memref<9x12x16xf32, #tpu.memory_space<vmem>>, vector<1x4x16xf32>
      %247 = vector.shape_cast %246 : vector<1x4x16xf32> to vector<4x16xf32>
      %248 = vector.shape_cast %245 : vector<4x16xf32> to vector<1x4x16xf32>
      tpu.vector_store %arg9[%c7, %c0_145, %c0_146], %248 {strides = array<i32>} : memref<9x12x16xf32, #tpu.memory_space<vmem>>, vector<1x4x16xf32>,
      %249 = vector.extract_strided_slice %160 {offsets = [28, 16], sizes = [4, 16], strides = [1, 1]} : vector<32x48xf32> to vector<4x16xf32>
      %c7_147 = arith.constant 7 : index
      %c4_148 = arith.constant 4 : index
      %c0_149 = arith.constant 0 : index
      %250 = vector.load %arg9[%c7_147, %c4_148, %c0_149] : memref<9x12x16xf32, #tpu.memory_space<vmem>>, vector<1x4x16xf32>
      %251 = vector.shape_cast %250 : vector<1x4x16xf32> to vector<4x16xf32>
      %252 = vector.shape_cast %249 : vector<4x16xf32> to vector<1x4x16xf32>
      tpu.vector_store %arg9[%c7_147, %c4_148, %c0_149], %252 {strides = array<i32>} : memref<9x12x16xf32, #tpu.memory_space<vmem>>, vector<1x4x16xf32>,
      %253 = vector.extract_strided_slice %160 {offsets = [28, 32], sizes = [4, 16], strides = [1, 1]} : vector<32x48xf32> to vector<4x16xf32>
      %c7_150 = arith.constant 7 : index
      %c8_151 = arith.constant 8 : index
      %c0_152 = arith.constant 0 : index
      %254 = vector.load %arg9[%c7_150, %c8_151, %c0_152] : memref<9x12x16xf32, #tpu.memory_space<vmem>>, vector<1x4x16xf32>
      %255 = vector.shape_cast %254 : vector<1x4x16xf32> to vector<4x16xf32>
      %256 = vector.shape_cast %253 : vector<4x16xf32> to vector<1x4x16xf32>
      tpu.vector_store %arg9[%c7_150, %c8_151, %c0_152], %256 {strides = array<i32>} : memref<9x12x16xf32, #tpu.memory_space<vmem>>, vector<1x4x16xf32>,
      %cst_153 = arith.constant 0.000000e+00 : f32
      %257 = vector.broadcast %cst_153 : f32 to vector<12x16xf32>
      %c8_154 = arith.constant 8 : index
      %c0_155 = arith.constant 0 : index
      %c0_156 = arith.constant 0 : index
      %258 = vector.load %arg9[%c8_154, %c0_155, %c0_156] : memref<9x12x16xf32, #tpu.memory_space<vmem>>, vector<1x12x16xf32>
      %259 = vector.shape_cast %258 : vector<1x12x16xf32> to vector<12x16xf32>
      %260 = vector.shape_cast %257 : vector<12x16xf32> to vector<1x12x16xf32>
      tpu.vector_store %arg9[%c8_154, %c0_155, %c0_156], %260 {strides = array<i32>} : memref<9x12x16xf32, #tpu.memory_space<vmem>>, vector<1x12x16xf32>,
    } else {
    }
    %c16_i32 = arith.constant 16 : i32
    %3 = arith.muli %arg1, %c16_i32 : i32
    %c0_i32_1 = arith.constant 0 : i32
    %4 = arith.addi %3, %c0_i32_1 : i32
    %5 = arith.index_cast %4 : i32 to index
    %6 = memref.load %arg2[%5] : memref<18xi32, #tpu.memory_space<smem>>
    %7 = arith.index_cast %6 : i32 to index
    %c0 = arith.constant 0 : index
    %c0_2 = arith.constant 0 : index
    %8 = vector.load %arg9[%7, %c0, %c0_2] : memref<9x12x16xf32, #tpu.memory_space<vmem>>, vector<1x12x16xf32>
    %9 = vector.shape_cast %8 : vector<1x12x16xf32> to vector<12x16xf32>
    %c0_3 = arith.constant 0 : index
    %c0_4 = arith.constant 0 : index
    %10 = vector.load %arg10[%c0_3, %c0_4] : memref<12x288xf32, #tpu.memory_space<vmem>>, vector<12x16xf32>
    tpu.vector_store %arg10[%c0_3, %c0_4], %9 {strides = array<i32>} : memref<12x288xf32, #tpu.memory_space<vmem>>, vector<12x16xf32>,
    %c1_i32 = arith.constant 1 : i32
    %11 = arith.addi %3, %c1_i32 : i32
    %12 = arith.index_cast %11 : i32 to index
    %13 = memref.load %arg2[%12] : memref<18xi32, #tpu.memory_space<smem>>
    %14 = arith.index_cast %13 : i32 to index
    %c0_5 = arith.constant 0 : index
    %c0_6 = arith.constant 0 : index
    %15 = vector.load %arg9[%14, %c0_5, %c0_6] : memref<9x12x16xf32, #tpu.memory_space<vmem>>, vector<1x12x16xf32>
    %16 = vector.shape_cast %15 : vector<1x12x16xf32> to vector<12x16xf32>
    %c0_7 = arith.constant 0 : index
    %c16 = arith.constant 16 : index
    %17 = vector.load %arg10[%c0_7, %c16] : memref<12x288xf32, #tpu.memory_space<vmem>>, vector<12x16xf32>
    tpu.vector_store %arg10[%c0_7, %c16], %16 {strides = array<i32>} : memref<12x288xf32, #tpu.memory_space<vmem>>, vector<12x16xf32>,
    %c2_i32 = arith.constant 2 : i32
    %18 = arith.addi %3, %c2_i32 : i32
    %19 = arith.index_cast %18 : i32 to index
    %20 = memref.load %arg2[%19] : memref<18xi32, #tpu.memory_space<smem>>
    %21 = arith.index_cast %20 : i32 to index
    %c0_8 = arith.constant 0 : index
    %c0_9 = arith.constant 0 : index
    %22 = vector.load %arg9[%21, %c0_8, %c0_9] : memref<9x12x16xf32, #tpu.memory_space<vmem>>, vector<1x12x16xf32>
    %23 = vector.shape_cast %22 : vector<1x12x16xf32> to vector<12x16xf32>
    %c0_10 = arith.constant 0 : index
    %c32 = arith.constant 32 : index
    %24 = vector.load %arg10[%c0_10, %c32] : memref<12x288xf32, #tpu.memory_space<vmem>>, vector<12x16xf32>
    tpu.vector_store %arg10[%c0_10, %c32], %23 {strides = array<i32>} : memref<12x288xf32, #tpu.memory_space<vmem>>, vector<12x16xf32>,
    %c3_i32 = arith.constant 3 : i32
    %25 = arith.addi %3, %c3_i32 : i32
    %26 = arith.index_cast %25 : i32 to index
    %27 = memref.load %arg2[%26] : memref<18xi32, #tpu.memory_space<smem>>
    %28 = arith.index_cast %27 : i32 to index
    %c0_11 = arith.constant 0 : index
    %c0_12 = arith.constant 0 : index
    %29 = vector.load %arg9[%28, %c0_11, %c0_12] : memref<9x12x16xf32, #tpu.memory_space<vmem>>, vector<1x12x16xf32>
    %30 = vector.shape_cast %29 : vector<1x12x16xf32> to vector<12x16xf32>
    %c0_13 = arith.constant 0 : index
    %c48 = arith.constant 48 : index
    %31 = vector.load %arg10[%c0_13, %c48] : memref<12x288xf32, #tpu.memory_space<vmem>>, vector<12x16xf32>
    tpu.vector_store %arg10[%c0_13, %c48], %30 {strides = array<i32>} : memref<12x288xf32, #tpu.memory_space<vmem>>, vector<12x16xf32>,
    %c4_i32 = arith.constant 4 : i32
    %32 = arith.addi %3, %c4_i32 : i32
    %33 = arith.index_cast %32 : i32 to index
    %34 = memref.load %arg2[%33] : memref<18xi32, #tpu.memory_space<smem>>
    %35 = arith.index_cast %34 : i32 to index
    %c0_14 = arith.constant 0 : index
    %c0_15 = arith.constant 0 : index
    %36 = vector.load %arg9[%35, %c0_14, %c0_15] : memref<9x12x16xf32, #tpu.memory_space<vmem>>, vector<1x12x16xf32>
    %37 = vector.shape_cast %36 : vector<1x12x16xf32> to vector<12x16xf32>
    %c0_16 = arith.constant 0 : index
    %c64 = arith.constant 64 : index
    %38 = vector.load %arg10[%c0_16, %c64] : memref<12x288xf32, #tpu.memory_space<vmem>>, vector<12x16xf32>
    tpu.vector_store %arg10[%c0_16, %c64], %37 {strides = array<i32>} : memref<12x288xf32, #tpu.memory_space<vmem>>, vector<12x16xf32>,
    %c5_i32 = arith.constant 5 : i32
    %39 = arith.addi %3, %c5_i32 : i32
    %40 = arith.index_cast %39 : i32 to index
    %41 = memref.load %arg2[%40] : memref<18xi32, #tpu.memory_space<smem>>
    %42 = arith.index_cast %41 : i32 to index
    %c0_17 = arith.constant 0 : index
    %c0_18 = arith.constant 0 : index
    %43 = vector.load %arg9[%42, %c0_17, %c0_18] : memref<9x12x16xf32, #tpu.memory_space<vmem>>, vector<1x12x16xf32>
    %44 = vector.shape_cast %43 : vector<1x12x16xf32> to vector<12x16xf32>
    %c0_19 = arith.constant 0 : index
    %c80 = arith.constant 80 : index
    %45 = vector.load %arg10[%c0_19, %c80] : memref<12x288xf32, #tpu.memory_space<vmem>>, vector<12x16xf32>
    tpu.vector_store %arg10[%c0_19, %c80], %44 {strides = array<i32>} : memref<12x288xf32, #tpu.memory_space<vmem>>, vector<12x16xf32>,
    %c6_i32 = arith.constant 6 : i32
    %46 = arith.addi %3, %c6_i32 : i32
    %47 = arith.index_cast %46 : i32 to index
    %48 = memref.load %arg2[%47] : memref<18xi32, #tpu.memory_space<smem>>
    %49 = arith.index_cast %48 : i32 to index
    %c0_20 = arith.constant 0 : index
    %c0_21 = arith.constant 0 : index
    %50 = vector.load %arg9[%49, %c0_20, %c0_21] : memref<9x12x16xf32, #tpu.memory_space<vmem>>, vector<1x12x16xf32>
    %51 = vector.shape_cast %50 : vector<1x12x16xf32> to vector<12x16xf32>
    %c0_22 = arith.constant 0 : index
    %c96 = arith.constant 96 : index
    %52 = vector.load %arg10[%c0_22, %c96] : memref<12x288xf32, #tpu.memory_space<vmem>>, vector<12x16xf32>
    tpu.vector_store %arg10[%c0_22, %c96], %51 {strides = array<i32>} : memref<12x288xf32, #tpu.memory_space<vmem>>, vector<12x16xf32>,
    %c7_i32 = arith.constant 7 : i32
    %53 = arith.addi %3, %c7_i32 : i32
    %54 = arith.index_cast %53 : i32 to index
    %55 = memref.load %arg2[%54] : memref<18xi32, #tpu.memory_space<smem>>
    %56 = arith.index_cast %55 : i32 to index
    %c0_23 = arith.constant 0 : index
    %c0_24 = arith.constant 0 : index
    %57 = vector.load %arg9[%56, %c0_23, %c0_24] : memref<9x12x16xf32, #tpu.memory_space<vmem>>, vector<1x12x16xf32>
    %58 = vector.shape_cast %57 : vector<1x12x16xf32> to vector<12x16xf32>
    %c0_25 = arith.constant 0 : index
    %c112 = arith.constant 112 : index
    %59 = vector.load %arg10[%c0_25, %c112] : memref<12x288xf32, #tpu.memory_space<vmem>>, vector<12x16xf32>
    tpu.vector_store %arg10[%c0_25, %c112], %58 {strides = array<i32>} : memref<12x288xf32, #tpu.memory_space<vmem>>, vector<12x16xf32>,
    %c8_i32 = arith.constant 8 : i32
    %60 = arith.addi %3, %c8_i32 : i32
    %61 = arith.index_cast %60 : i32 to index
    %62 = memref.load %arg2[%61] : memref<18xi32, #tpu.memory_space<smem>>
    %63 = arith.index_cast %62 : i32 to index
    %c0_26 = arith.constant 0 : index
    %c0_27 = arith.constant 0 : index
    %64 = vector.load %arg9[%63, %c0_26, %c0_27] : memref<9x12x16xf32, #tpu.memory_space<vmem>>, vector<1x12x16xf32>
    %65 = vector.shape_cast %64 : vector<1x12x16xf32> to vector<12x16xf32>
    %c0_28 = arith.constant 0 : index
    %c128 = arith.constant 128 : index
    %66 = vector.load %arg10[%c0_28, %c128] : memref<12x288xf32, #tpu.memory_space<vmem>>, vector<12x16xf32>
    tpu.vector_store %arg10[%c0_28, %c128], %65 {strides = array<i32>} : memref<12x288xf32, #tpu.memory_space<vmem>>, vector<12x16xf32>,
    %c9_i32 = arith.constant 9 : i32
    %67 = arith.addi %3, %c9_i32 : i32
    %68 = arith.index_cast %67 : i32 to index
    %69 = memref.load %arg2[%68] : memref<18xi32, #tpu.memory_space<smem>>
    %70 = arith.index_cast %69 : i32 to index
    %c0_29 = arith.constant 0 : index
    %c0_30 = arith.constant 0 : index
    %71 = vector.load %arg9[%70, %c0_29, %c0_30] : memref<9x12x16xf32, #tpu.memory_space<vmem>>, vector<1x12x16xf32>
    %72 = vector.shape_cast %71 : vector<1x12x16xf32> to vector<12x16xf32>
    %c0_31 = arith.constant 0 : index
    %c144 = arith.constant 144 : index
    %73 = vector.load %arg10[%c0_31, %c144] : memref<12x288xf32, #tpu.memory_space<vmem>>, vector<12x16xf32>
    tpu.vector_store %arg10[%c0_31, %c144], %72 {strides = array<i32>} : memref<12x288xf32, #tpu.memory_space<vmem>>, vector<12x16xf32>,
    %c10_i32 = arith.constant 10 : i32
    %74 = arith.addi %3, %c10_i32 : i32
    %75 = arith.index_cast %74 : i32 to index
    %76 = memref.load %arg2[%75] : memref<18xi32, #tpu.memory_space<smem>>
    %77 = arith.index_cast %76 : i32 to index
    %c0_32 = arith.constant 0 : index
    %c0_33 = arith.constant 0 : index
    %78 = vector.load %arg9[%77, %c0_32, %c0_33] : memref<9x12x16xf32, #tpu.memory_space<vmem>>, vector<1x12x16xf32>
    %79 = vector.shape_cast %78 : vector<1x12x16xf32> to vector<12x16xf32>
    %c0_34 = arith.constant 0 : index
    %c160 = arith.constant 160 : index
    %80 = vector.load %arg10[%c0_34, %c160] : memref<12x288xf32, #tpu.memory_space<vmem>>, vector<12x16xf32>
    tpu.vector_store %arg10[%c0_34, %c160], %79 {strides = array<i32>} : memref<12x288xf32, #tpu.memory_space<vmem>>, vector<12x16xf32>,
    %c11_i32 = arith.constant 11 : i32
    %81 = arith.addi %3, %c11_i32 : i32
    %82 = arith.index_cast %81 : i32 to index
    %83 = memref.load %arg2[%82] : memref<18xi32, #tpu.memory_space<smem>>
    %84 = arith.index_cast %83 : i32 to index
    %c0_35 = arith.constant 0 : index
    %c0_36 = arith.constant 0 : index
    %85 = vector.load %arg9[%84, %c0_35, %c0_36] : memref<9x12x16xf32, #tpu.memory_space<vmem>>, vector<1x12x16xf32>
    %86 = vector.shape_cast %85 : vector<1x12x16xf32> to vector<12x16xf32>
    %c0_37 = arith.constant 0 : index
    %c176 = arith.constant 176 : index
    %87 = vector.load %arg10[%c0_37, %c176] : memref<12x288xf32, #tpu.memory_space<vmem>>, vector<12x16xf32>
    tpu.vector_store %arg10[%c0_37, %c176], %86 {strides = array<i32>} : memref<12x288xf32, #tpu.memory_space<vmem>>, vector<12x16xf32>,
    %c12_i32 = arith.constant 12 : i32
    %88 = arith.addi %3, %c12_i32 : i32
    %89 = arith.index_cast %88 : i32 to index
    %90 = memref.load %arg2[%89] : memref<18xi32, #tpu.memory_space<smem>>
    %91 = arith.index_cast %90 : i32 to index
    %c0_38 = arith.constant 0 : index
    %c0_39 = arith.constant 0 : index
    %92 = vector.load %arg9[%91, %c0_38, %c0_39] : memref<9x12x16xf32, #tpu.memory_space<vmem>>, vector<1x12x16xf32>
    %93 = vector.shape_cast %92 : vector<1x12x16xf32> to vector<12x16xf32>
    %c0_40 = arith.constant 0 : index
    %c192 = arith.constant 192 : index
    %94 = vector.load %arg10[%c0_40, %c192] : memref<12x288xf32, #tpu.memory_space<vmem>>, vector<12x16xf32>
    tpu.vector_store %arg10[%c0_40, %c192], %93 {strides = array<i32>} : memref<12x288xf32, #tpu.memory_space<vmem>>, vector<12x16xf32>,
    %c13_i32 = arith.constant 13 : i32
    %95 = arith.addi %3, %c13_i32 : i32
    %96 = arith.index_cast %95 : i32 to index
    %97 = memref.load %arg2[%96] : memref<18xi32, #tpu.memory_space<smem>>
    %98 = arith.index_cast %97 : i32 to index
    %c0_41 = arith.constant 0 : index
    %c0_42 = arith.constant 0 : index
    %99 = vector.load %arg9[%98, %c0_41, %c0_42] : memref<9x12x16xf32, #tpu.memory_space<vmem>>, vector<1x12x16xf32>
    %100 = vector.shape_cast %99 : vector<1x12x16xf32> to vector<12x16xf32>
    %c0_43 = arith.constant 0 : index
    %c208 = arith.constant 208 : index
    %101 = vector.load %arg10[%c0_43, %c208] : memref<12x288xf32, #tpu.memory_space<vmem>>, vector<12x16xf32>
    tpu.vector_store %arg10[%c0_43, %c208], %100 {strides = array<i32>} : memref<12x288xf32, #tpu.memory_space<vmem>>, vector<12x16xf32>,
    %c14_i32 = arith.constant 14 : i32
    %102 = arith.addi %3, %c14_i32 : i32
    %103 = arith.index_cast %102 : i32 to index
    %104 = memref.load %arg2[%103] : memref<18xi32, #tpu.memory_space<smem>>
    %105 = arith.index_cast %104 : i32 to index
    %c0_44 = arith.constant 0 : index
    %c0_45 = arith.constant 0 : index
    %106 = vector.load %arg9[%105, %c0_44, %c0_45] : memref<9x12x16xf32, #tpu.memory_space<vmem>>, vector<1x12x16xf32>
    %107 = vector.shape_cast %106 : vector<1x12x16xf32> to vector<12x16xf32>
    %c0_46 = arith.constant 0 : index
    %c224 = arith.constant 224 : index
    %108 = vector.load %arg10[%c0_46, %c224] : memref<12x288xf32, #tpu.memory_space<vmem>>, vector<12x16xf32>
    tpu.vector_store %arg10[%c0_46, %c224], %107 {strides = array<i32>} : memref<12x288xf32, #tpu.memory_space<vmem>>, vector<12x16xf32>,
    %c15_i32 = arith.constant 15 : i32
    %109 = arith.addi %3, %c15_i32 : i32
    %110 = arith.index_cast %109 : i32 to index
    %111 = memref.load %arg2[%110] : memref<18xi32, #tpu.memory_space<smem>>
    %112 = arith.index_cast %111 : i32 to index
    %c0_47 = arith.constant 0 : index
    %c0_48 = arith.constant 0 : index
    %113 = vector.load %arg9[%112, %c0_47, %c0_48] : memref<9x12x16xf32, #tpu.memory_space<vmem>>, vector<1x12x16xf32>
    %114 = vector.shape_cast %113 : vector<1x12x16xf32> to vector<12x16xf32>
    %c0_49 = arith.constant 0 : index
    %c240 = arith.constant 240 : index
    %115 = vector.load %arg10[%c0_49, %c240] : memref<12x288xf32, #tpu.memory_space<vmem>>, vector<12x16xf32>
    tpu.vector_store %arg10[%c0_49, %c240], %114 {strides = array<i32>} : memref<12x288xf32, #tpu.memory_space<vmem>>, vector<12x16xf32>,
    %c16_i32_50 = arith.constant 16 : i32
    %116 = arith.addi %3, %c16_i32_50 : i32
    %117 = arith.index_cast %116 : i32 to index
    %118 = memref.load %arg2[%117] : memref<18xi32, #tpu.memory_space<smem>>
    %119 = arith.index_cast %118 : i32 to index
    %c0_51 = arith.constant 0 : index
    %c0_52 = arith.constant 0 : index
    %120 = vector.load %arg9[%119, %c0_51, %c0_52] : memref<9x12x16xf32, #tpu.memory_space<vmem>>, vector<1x12x16xf32>
    %121 = vector.shape_cast %120 : vector<1x12x16xf32> to vector<12x16xf32>
    %c0_53 = arith.constant 0 : index
    %c256 = arith.constant 256 : index
    %122 = vector.load %arg10[%c0_53, %c256] : memref<12x288xf32, #tpu.memory_space<vmem>>, vector<12x16xf32>
    tpu.vector_store %arg10[%c0_53, %c256], %121 {strides = array<i32>} : memref<12x288xf32, #tpu.memory_space<vmem>>, vector<12x16xf32>,
    %c17_i32 = arith.constant 17 : i32
    %123 = arith.addi %3, %c17_i32 : i32
    %124 = arith.index_cast %123 : i32 to index
    %125 = memref.load %arg2[%124] : memref<18xi32, #tpu.memory_space<smem>>
    %126 = arith.index_cast %125 : i32 to index
    %c0_54 = arith.constant 0 : index
    %c0_55 = arith.constant 0 : index
    %127 = vector.load %arg9[%126, %c0_54, %c0_55] : memref<9x12x16xf32, #tpu.memory_space<vmem>>, vector<1x12x16xf32>
    %128 = vector.shape_cast %127 : vector<1x12x16xf32> to vector<12x16xf32>
    %c0_56 = arith.constant 0 : index
    %c272 = arith.constant 272 : index
    %129 = vector.load %arg10[%c0_56, %c272] : memref<12x288xf32, #tpu.memory_space<vmem>>, vector<12x16xf32>
    tpu.vector_store %arg10[%c0_56, %c272], %128 {strides = array<i32>} : memref<12x288xf32, #tpu.memory_space<vmem>>, vector<12x16xf32>,
    %cst = arith.constant 0.000000e+00 : f32
    %130 = vector.broadcast %cst : f32 to vector<8x256xf32>
    %c0_57 = arith.constant 0 : index
    %c0_58 = arith.constant 0 : index
    %c0_59 = arith.constant 0 : index
    %131 = vector.load %arg5[%c0_57, %c0_58, %c0_59] : memref<3x8x12xf32, #tpu.memory_space<vmem>>, vector<1x8x12xf32>
    %132 = vector.shape_cast %131 : vector<1x8x12xf32> to vector<8x12xf32>
    %c0_60 = arith.constant 0 : index
    %c0_61 = arith.constant 0 : index
    %133 = vector.load %arg10[%c0_60, %c0_61] : memref<12x288xf32, #tpu.memory_space<vmem>>, vector<12x256xf32>
    %cst_62 = arith.constant dense<0.000000e+00> : vector<8x256xf32>
    %134 = tpu.matmul %132, %133, %cst_62 {dimension_numbers = #tpu.dot_dimension_numbers<[1], [0], [0], [1], [0, 0, 1, 1], [], []>} : vector<8x12xf32>, vector<12x256xf32>, vector<8x256xf32> -> vector<8x256xf32>
    %135 = arith.addf %130, %134 : vector<8x256xf32>
    %c1 = arith.constant 1 : index
    %c0_63 = arith.constant 0 : index
    %c0_64 = arith.constant 0 : index
    %136 = vector.load %arg5[%c1, %c0_63, %c0_64] : memref<3x8x12xf32, #tpu.memory_space<vmem>>, vector<1x8x12xf32>
    %137 = vector.shape_cast %136 : vector<1x8x12xf32> to vector<8x12xf32>
    %c0_65 = arith.constant 0 : index
    %c16_66 = arith.constant 16 : index
    %138 = vector.load %arg10[%c0_65, %c16_66] : memref<12x288xf32, #tpu.memory_space<vmem>>, vector<12x256xf32>
    %cst_67 = arith.constant dense<0.000000e+00> : vector<8x256xf32>
    %139 = tpu.matmul %137, %138, %cst_67 {dimension_numbers = #tpu.dot_dimension_numbers<[1], [0], [0], [1], [0, 0, 1, 1], [], []>} : vector<8x12xf32>, vector<12x256xf32>, vector<8x256xf32> -> vector<8x256xf32>
    %140 = arith.addf %135, %139 : vector<8x256xf32>
    %c2 = arith.constant 2 : index
    %c0_68 = arith.constant 0 : index
    %c0_69 = arith.constant 0 : index
    %141 = vector.load %arg5[%c2, %c0_68, %c0_69] : memref<3x8x12xf32, #tpu.memory_space<vmem>>, vector<1x8x12xf32>
    %142 = vector.shape_cast %141 : vector<1x8x12xf32> to vector<8x12xf32>
    %c0_70 = arith.constant 0 : index
    %c32_71 = arith.constant 32 : index
    %143 = vector.load %arg10[%c0_70, %c32_71] : memref<12x288xf32, #tpu.memory_space<vmem>>, vector<12x256xf32>
    %cst_72 = arith.constant dense<0.000000e+00> : vector<8x256xf32>
    %144 = tpu.matmul %142, %143, %cst_72 {dimension_numbers = #tpu.dot_dimension_numbers<[1], [0], [0], [1], [0, 0, 1, 1], [], []>} : vector<8x12xf32>, vector<12x256xf32>, vector<8x256xf32> -> vector<8x256xf32>
    %145 = arith.addf %140, %144 : vector<8x256xf32>
    %c0_73 = arith.constant 0 : index
    %c0_74 = arith.constant 0 : index
    %146 = vector.load %arg6[%c0_73, %c0_74] : memref<8x1xf32, #tpu.memory_space<vmem>>, vector<8x1xf32>
    %147 = vector.broadcast %146 : vector<8x1xf32> to vector<8x256xf32>
    %148 = arith.mulf %145, %147 : vector<8x256xf32>
    %c0_75 = arith.constant 0 : index
    %c0_76 = arith.constant 0 : index
    %149 = vector.load %arg7[%c0_75, %c0_76] : memref<8x1xf32, #tpu.memory_space<vmem>>, vector<8x1xf32>
    %150 = vector.broadcast %149 : vector<8x1xf32> to vector<8x256xf32>
    %151 = arith.addf %148, %150 : vector<8x256xf32>
    %cst_77 = arith.constant 0.000000e+00 : f32
    %152 = vector.broadcast %cst_77 : f32 to vector<8x256xf32>
    %153 = arith.maximumf %151, %152 : vector<8x256xf32>
    %c0_78 = arith.constant 0 : index
    %c0_79 = arith.constant 0 : index
    %c0_80 = arith.constant 0 : index
    %154 = vector.load %arg8[%c0_78, %c0_79, %c0_80] : memref<1x8x256xf32, #tpu.memory_space<vmem>>, vector<1x8x256xf32>
    %155 = vector.shape_cast %154 : vector<1x8x256xf32> to vector<8x256xf32>
    %156 = vector.shape_cast %153 : vector<8x256xf32> to vector<1x8x256xf32>
    tpu.vector_store %arg8[%c0_78, %c0_79, %c0_80], %156 {strides = array<i32>} : memref<1x8x256xf32, #tpu.memory_space<vmem>>, vector<1x8x256xf32>,
    return
  }
  func.func @transform_0(%arg0: i32, %arg1: i32, %arg2: memref<18xi32, #tpu.memory_space<smem>>) -> (i32, i32, i32) {
    %c0_i32 = arith.constant 0 : i32
    %c0_i32_0 = arith.constant 0 : i32
    %c0_i32_1 = arith.constant 0 : i32
    return %arg0, %c0_i32, %c0_i32_0 : i32, i32, i32
  }
  func.func @transform_1(%arg0: i32, %arg1: i32, %arg2: memref<18xi32, #tpu.memory_space<smem>>) -> (i32, i32) {
    %c0_i32 = arith.constant 0 : i32
    %c0_i32_0 = arith.constant 0 : i32
    %c0_i32_1 = arith.constant 0 : i32
    return %c0_i32, %c0_i32_0 : i32, i32
  }
  func.func @transform_2(%arg0: i32, %arg1: i32, %arg2: memref<18xi32, #tpu.memory_space<smem>>) -> (i32, i32, i32) {
    %c0_i32 = arith.constant 0 : i32
    %c0_i32_0 = arith.constant 0 : i32
    %c0_i32_1 = arith.constant 0 : i32
    %c0_i32_2 = arith.constant 0 : i32
    return %c0_i32, %c0_i32_0, %c0_i32_1 : i32, i32, i32
  }
  func.func @transform_3(%arg0: i32, %arg1: i32, %arg2: memref<18xi32, #tpu.memory_space<smem>>) -> (i32, i32) {
    %c0_i32 = arith.constant 0 : i32
    %c0_i32_0 = arith.constant 0 : i32
    %c0_i32_1 = arith.constant 0 : i32
    return %c0_i32, %c0_i32_0 : i32, i32
  }
  func.func @transform_4(%arg0: i32, %arg1: i32, %arg2: memref<18xi32, #tpu.memory_space<smem>>) -> (i32, i32) {
    %c0_i32 = arith.constant 0 : i32
    %c0_i32_0 = arith.constant 0 : i32
    %c0_i32_1 = arith.constant 0 : i32
    return %c0_i32, %c0_i32_0 : i32, i32
  }
  func.func @transform_5(%arg0: i32, %arg1: i32, %arg2: memref<18xi32, #tpu.memory_space<smem>>) -> (i32, i32, i32) {
    %c0_i32 = arith.constant 0 : i32
    %c0_i32_0 = arith.constant 0 : i32
    return %arg0, %c0_i32, %arg1 : i32, i32, i32
  }
}

</mosaic_0001>

<bundles_post_ra>
// kernel: up_conv_forward.1
= control target key start
LH: loop header
LB: loop body
LE: loop exit
PB: predicated region body
PF: predicated region fallthrough
CT: control target
= control target key end

     0   :  { %s1567_s0 = inlined_call_operand.vmem [shape: s32[18], index: 0, kind: input, shape index: {}]   ;;  %s1568_s1 = inlined_call_operand.vmem [shape: f32[2,32,8], index: 1, kind: input, shape index: {}]   ;;  %s1569_s2 = inlined_call_operand.vmem [shape: f32[8,48], index: 2, kind: input, shape index: {}]   ;;  %s1570_s3 = inlined_call_operand.vmem [shape: f32[3,8,12], index: 3, kind: input, shape index: {}]   ;;  %s1571_s4 = inlined_call_operand.vmem [shape: f32[8,1], index: 4, kind: input, shape index: {}]   ;;  %s1572_s5 = inlined_call_operand.vmem [shape: f32[8,1], index: 5, kind: input, shape index: {}]   ;;  %s1573_s6 = inlined_call_operand.vmem [shape: f32[2,8,256], index: 6, kind: output, shape index: {}]  }
   0x1   :  { %s11_s23 = sshll.u32 %s1567_s0, 4  ;;  %s12_s23 = int_to_ptr.vmem [resolvable:$true] %s11_s23 }
   0x2   :  { %s1302_s24 = scalar_lea.vmem %s12_s23, 16  ;;  %p1307_p1 = scmp.lt.s32.totalorder %s12_s23, %s12_s23 }
   0x3   :  { %p1303_p0 = scmp.ne.s32.totalorder %s12_s23, %s1302_s24  ;;  %p1308_p2 = scmp.lt.s32.totalorder %s1302_s24, %s1302_s24 }
   0x5   :  { %p1309_p3 = por %p1308_p2, %p1307_p1 }
   0x7   :  { %p1310_p4 = pnand %p1309_p3, %p1303_p0 }
   0x9   :  { %1313 = shalt.err (!%p1310_p4)  }
   0xa   :  { %s1340_s25 = smov [#allocation5]  }
   0xb   :  { %14 = dma.vmem_to_smem %s12_s23, 16, %s1340_s25, [#allocation4] }
   0xc   :  { %1326 = dma.done.wait [#allocation4], 16 }
   0xd   :  { %1327 = vsyncadd [#allocation4], 4294967280 }
   0xe   :  { %16 = sfence }
   0xf   :  { %s1389_s26 = smov 0   ;;  %s1391_s27 = smov 0  }
  0x10   :  { %s1393_s28 = smov 0  }
  0x11 LB: > { %s34_s0 = sadd.s32 1, %s1334_s27  ;;  %p1141_p5 = scmp.ge.s32.totalorder %s1338_s28, 1  ;;  %s1338_s28 = sphi %s1393_s28, %s22_s28   ;;  %s1334_s27 = sphi %s1391_s27, %s1577_s27   ;;  %s1330_s26 = sphi %s1389_s26, %s1576_s26  }
  0x12   : > { %p36_p6 = scmp.ge.s32.totalorder %s34_s0, 2  ;;  %p208_p7 = scmp.lt.s32.totalorder %s1338_s28, 3 }
  0x14   : > { %s1579_s0 = smov (%p36_p6, %s34_s0), 0  ;;  %p209_p8 = pnand %p1141_p5, %p208_p7 }
  0x15   : > { %v263_v0 = vld [vmem:[%s1569_s2] sm:$0xff] (!%p209_p8)  ;;  %p240_p9 = scmp.lt.s32.totalorder (!%p209_p8), %s1330_s26, 1  ;;  %vm264_vm0 = vcmask (!%p209_p8), 64512   ;;  %vm362_vm1 = vcmask (!%p209_p8), 125952   ;;  %vm374_vm2 = vcmask (!%p209_p8), 130052   ;;  %vm424_vm3 = vcmask (!%p209_p8), 130048  }
  0x16   : > { %212 = sbr.rel (%p209_p8) target bundleno = 914 (0x392), region = 40  ;;  %1205 = vmatprep.subr.mxu0 (!%p209_p8), %v263_v0  ;;  %s1341_s11 = smov (!%p209_p8), 112   ;;  %v1342_v7 = vmov (!%p209_p8), 0.0   ;;  %vm453_vm4 = vcmask (!%p209_p8), 257152   ;;  %vm451_vm5 = vcmask (!%p209_p8), 261248   ;;  %vm471_vm6 = vcmask (!%p209_p8), 388352  }
  0x17   : > { %1206 = vmatpush3.msra.mxu0 (!%p209_p8), %v263_v0  ;;  %425 = vst.msk [vmem:[#allocation2 + $0x80] sm:$0xff] (!%p209_p8), %vm424_vm3, %v1342_v7  ;;  %892 = vmatprep.mubr.f32.mxu1 (!%p209_p8), %v1342_v7  ;;  %s1343_s12 = smov (!%p209_p8), 96   ;;  %s1167_s13 = sld [smem:[#allocation5 + $0x9]] (!%p209_p8)  ;;  %vm469_vm7 = vcmask (!%p209_p8), 392448   ;;  %vm489_vm8 = vcmask (!%p209_p8), 519552   ;;  %vm487_vm9 = vcmask (!%p209_p8), 523648  }
  0x18   : > { %426 = vst.msk [vmem:[#allocation2 + $0x88] sm:$0xf] (!%p209_p8), %vm362_vm1, %v1342_v7  ;;  %s1151_s14 = sld [smem:[#allocation5 + $0x1]] (!%p209_p8)  ;;  %s1169_s16 = sld [smem:[#allocation5 + $0xa]] (!%p209_p8)  ;;  %vm507_vm10 = vcmask (!%p209_p8), 650752   ;;  %vm505_vm11 = vcmask (!%p209_p8), 654848  }
  0x19   : > { %s1454_s17 = sld [smem:[#allocation5 + $0x2]] (!%p209_p8)  ;;  %s1456_s18 = sld [smem:[#allocation5 + $0x8]] (!%p209_p8)  ;;  %vm525_vm12 = vcmask (!%p209_p8), 781952   ;;  %vm523_vm13 = vcmask (!%p209_p8), 786048   ;;  %vm543_vm14 = vcmask (!%p209_p8), 913152   ;;  %vm541_vm15 = vcmask (!%p209_p8), 917248  }
  0x1a   : > { %s1458_s19 = sld [smem:[#allocation5]] (!%p209_p8)  ;;  %s1344_s23 = smov (!%p209_p8), 16  }
  0x1b   : > { %s1460_s21 = sld [smem:[#allocation5 + $0x10]] (!%p209_p8)  ;;  %s1464_s25 = sld [smem:[#allocation5 + $0xb]] (!%p209_p8) }
  0x1c   : > { %s1466_s29 = sld [smem:[#allocation5 + $0x3]] (!%p209_p8) }
  0x1d   : > { %s1581_s26 = smov (!%p240_p9, %s1330_s26), 1  ;;  %s1168_s15 = sshll.u32 %s1167_s13, 4 }
  0x1e   : > { %s1198_s7 = sshll.u32 %s1581_s26, 5  ;;  %s1152_s20 = sshll.u32 %s1151_s14, 4 }
  0x1f   : > { %s244_s10 = scalar_lea.vmem %s1568_s1, %s1198_s7  ;;  %s574_s22 = scalar_lea.vmem [#allocation2], %s1168_s15 }
  0x20   : > { %v259_v1 = vld [vmem:[%s244_s10] sm:$0xff]  ;;  %v260_v2 = vld [vmem:[%s244_s10 + $0x8] sm:$0xff]  ;;  %v261_v3 = vld [vmem:[%s244_s10 + $0x10] sm:$0xff]  ;;  %s1170_s24 = sshll.u32 %s1169_s16, 4  ;;  %s440_s30 = scalar_lea.vmem [#allocation2], %s1152_s20 }
  0x21   : > { %1207 = vmatprep.mubr.msk.f32.mxu0 %vm264_vm0, %v259_v1  ;;  %v262_v4 = vld [vmem:[%s244_s10 + $0x18] sm:$0xff]  ;;  %s1154_s7 = sshll.u32 %s1454_s17, 4  ;;  %s1166_s8 = sshll.u32 %s1456_s18, 4 }
  0x22   : > { %1208 = vmatmul.mubr.msk.f32.vlgmr.msra.gmra.mrb[0].mxu0 %vm264_vm0, %v260_v2  ;;  %s1150_s9 = sshll.u32 %s1458_s19, 4  ;;  %s1182_s10 = sshll.u32 %s1460_s21, 4 }
  0x23   : > { %1210 = vmatprep.mubr.msk.f32.mxu0 %vm264_vm0, %v261_v3  ;;  %s590_s13 = scalar_lea.vmem [#allocation2], %s1170_s24  ;;  %s1345_s14 = smov 32  }
  0x24   : > { %s458_s15 = scalar_lea.vmem [#allocation2], %s1154_s7  ;;  %s1172_s16 = sshll.u32 %s1464_s25, 4 }
  0x25   : > { %s1475_s20 = sld [smem:[#allocation5 + $0xc]]  ;;  %s566_s17 = scalar_lea.vmem [#allocation2], %s1166_s8 }
  0x26   : > { %1211 = vmatmul.mubr.msk.f32.gmra.mrb[2].mxu0 %vm264_vm0, %v262_v4  ;;  %s686_s18 = scalar_lea.vmem [#allocation2], %s1182_s10  ;;  %s1157_s19 = sld [smem:[#allocation5 + $0x4]]  ;;  %vm561_vm0 = vcmask 1044352  }
  0x27   : > { %814 = vmatprep.mubr.f32.mxu0 %v1342_v7  ;;  %s1156_s21 = sshll.u32 %s1466_s29, 4  ;;  %s606_s24 = scalar_lea.vmem [#allocation2], %s1172_s16 }
  0x28   : > { %s1346_s25 = smov 48   ;;  %s1175_s7 = sld [smem:[#allocation5 + $0xd]] }
  0x29   : > { %s476_s8 = scalar_lea.vmem [#allocation2], %s1156_s21  ;;  %s1179_s21 = sld [smem:[#allocation5 + $0xf]] }
  0x2c   : > { %s1158_s10 = sshll.u32 %s1157_s19, 4 }
  0x2d   : > { %s494_s16 = scalar_lea.vmem [#allocation2], %s1158_s10 }
  0x2e   : > { %s1176_s29 = sshll.u32 %s1175_s7, 4 }
  0xf5   : > { %v1209_v5 = vpop.f32.mrb[0].mxu0 }
  0xf6   : > { %379 = vst.msk [vmem:[#allocation2 + $0x20] sm:$0xf] %vm362_vm1, %v1209_v5  ;;  %381 = vrot.lane.b32.xlu1 %v1209_v5, %s1341_s11  ;;  %v343_v6 = vpop.f32.mrb[1].mxu0 }
  0xf7   : > { %390 = vst.msk [vmem:[#allocation2 + $0x2c] sm:$0xf0] %vm374_vm2, %v1209_v5  ;;  %375 = vst.msk [vmem:[#allocation2 + $0xc] sm:$0xf0] %vm374_vm2, %v343_v6  ;;  %365 = vrot.lane.b32.xlu0 %v343_v6, %s1341_s11 }
  0xf8   : > { %363 = vst.msk [vmem:[#allocation2] sm:$0xf] %vm362_vm1, %v343_v6 }
  0xf9   : > { %v1212_v8 = vpop.f32.mrb[2].mxu0 }
  0xfa   : > { %385 = vrot.lane.b32.xlu1 %v1209_v5, %s1343_s12  ;;  %409 = vst.msk [vmem:[#allocation2 + $0x60] sm:$0xf] %vm362_vm1, %v1212_v8  ;;  %v353_v9 = vpop.f32.mrb[3].mxu0 }
  0xfb   : > { %420 = vst.msk [vmem:[#allocation2 + $0x6c] sm:$0xf0] %vm374_vm2, %v1212_v8  ;;  %369 = vrot.lane.b32.xlu0 %v343_v6, %s1343_s12  ;;  %405 = vst.msk [vmem:[#allocation2 + $0x4c] sm:$0xf0] %vm374_vm2, %v353_v9 }
  0xfc   : > { %394 = vst.msk [vmem:[#allocation2 + $0x40] sm:$0xf] %vm362_vm1, %v353_v9 }
  0xfe   : > { %400 = vrot.lane.b32.xlu1 %v353_v9, %s1343_s12 }
  0xff   : > { %396 = vrot.lane.b32.xlu0 %v353_v9, %s1341_s11 }
 0x102   : > { %415 = vrot.lane.b32.xlu1 %v1212_v8, %s1343_s12 }
 0x103   : > { %411 = vrot.lane.b32.xlu0 %v1212_v8, %s1341_s11 }
 0x168   : > { %v382_v10 = vpop.permute.xlu1 %381 }
 0x169   : > { %384 = vst.msk [vmem:[#allocation2 + $0x24] sm:$0xf] %vm362_vm1, %v382_v10  ;;  %v366_v11 = vpop.permute.xlu0 %365 }
 0x16a   : > { %391 = vst.msk [vmem:[#allocation2 + $0x30] sm:$0xf0] %vm374_vm2, %v382_v10  ;;  %376 = vst.msk [vmem:[#allocation2 + $0x10] sm:$0xf0] %vm374_vm2, %v366_v11 }
 0x16b   : > { %368 = vst.msk [vmem:[#allocation2 + $0x4] sm:$0xf] %vm362_vm1, %v366_v11 }
 0x16c   : > { %v386_v12 = vpop.permute.xlu1 %385 }
 0x16d   : > { %388 = vst.msk [vmem:[#allocation2 + $0x28] sm:$0xf] %vm362_vm1, %v386_v12  ;;  %v370_v13 = vpop.permute.xlu0 %369 }
 0x16e   : > { %392 = vst.msk [vmem:[#allocation2 + $0x34] sm:$0xf0] %vm374_vm2, %v386_v12  ;;  %377 = vst.msk [vmem:[#allocation2 + $0x14] sm:$0xf0] %vm374_vm2, %v370_v13 }
 0x16f   : > { %372 = vst.msk [vmem:[#allocation2 + $0x8] sm:$0xf] %vm362_vm1, %v370_v13 }
 0x170   : > { %v401_v14 = vpop.permute.xlu1 %400 }
 0x171   : > { %403 = vst.msk [vmem:[#allocation2 + $0x48] sm:$0xf] %vm362_vm1, %v401_v14  ;;  %v397_v15 = vpop.permute.xlu0 %396 }
 0x172   : > { %407 = vst.msk [vmem:[#allocation2 + $0x54] sm:$0xf0] %vm374_vm2, %v401_v14  ;;  %406 = vst.msk [vmem:[#allocation2 + $0x50] sm:$0xf0] %vm374_vm2, %v397_v15 }
 0x173   : > { %399 = vst.msk [vmem:[#allocation2 + $0x44] sm:$0xf] %vm362_vm1, %v397_v15 }
 0x174   : > { %v416_v16 = vpop.permute.xlu1 %415 }
 0x175   : > { %418 = vst.msk [vmem:[#allocation2 + $0x68] sm:$0xf] %vm362_vm1, %v416_v16  ;;  %v412_v17 = vpop.permute.xlu0 %411 }
 0x176   : > { %422 = vst.msk [vmem:[#allocation2 + $0x74] sm:$0xf0] %vm374_vm2, %v416_v16  ;;  %421 = vst.msk [vmem:[#allocation2 + $0x70] sm:$0xf0] %vm374_vm2, %v412_v17  ;;  %vm745_vm2 = vcmask 1043456  }
 0x177   : > { %414 = vst.msk [vmem:[#allocation2 + $0x64] sm:$0xf] %vm362_vm1, %v412_v17 }
 0x17e   : > { %v576_v18 = vld [vmem:[%s574_s22 + $0x8] sm:$0xf]  ;;  %v575_v19 = vld [vmem:[%s574_s22] sm:$0xff]  ;;  %s430_s22 = scalar_lea.vmem [#allocation2], %s1150_s9  ;;  %s1159_s9 = sld [smem:[#allocation5 + $0x5]] }
 0x17f   : > { %581 = vrot.lane.b32.xlu1 %v576_v18, %s1344_s23  ;;  %579 = vrot.lane.b32.xlu0 %v575_v19, %s1344_s23  ;;  %v442_v20 = vld [vmem:[%s440_s30 + $0x8] sm:$0xf]  ;;  %v441_v21 = vld [vmem:[%s440_s30] sm:$0xff]  ;;  %s1174_s30 = sshll.u32 %s1475_s20, 4 }
 0x180   : > { %v592_v22 = vld [vmem:[%s590_s13 + $0x8] sm:$0xf]  ;;  %v591_v23 = vld [vmem:[%s590_s13] sm:$0xff]  ;;  %s622_s13 = scalar_lea.vmem [#allocation2], %s1174_s30  ;;  %s1183_s30 = sld [smem:[#allocation5 + $0x11]] }
 0x181   : > { %v460_v24 = vld [vmem:[%s458_s15 + $0x8] sm:$0xf]  ;;  %v459_v25 = vld [vmem:[%s458_s15] sm:$0xff]  ;;  %s1177_s15 = sld [smem:[#allocation5 + $0xe]] }
 0x182   : > { %v568_v26 = vld [vmem:[%s566_s17 + $0x8] sm:$0xf]  ;;  %v567_v27 = vld [vmem:[%s566_s17] sm:$0xff]  ;;  %s1161_s17 = sld [smem:[#allocation5 + $0x6]] }
 0x183   : > { %447 = vrot.lane.b32.xlu1 %v442_v20, %s1344_s23  ;;  %445 = vrot.lane.b32.xlu0 %v441_v21, %s1344_s23  ;;  %v432_v28 = vld [vmem:[%s430_s22 + $0x8] sm:$0xf]  ;;  %570 = vst.msk [vmem:[#allocation3 + $0x20] sm:$0xf] %vm362_vm1, %v568_v26  ;;  %v431_v29 = vld [vmem:[%s430_s22] sm:$0xff]  ;;  %s638_s22 = scalar_lea.vmem [#allocation2], %s1176_s29 }
 0x184   : > { %569 = vst.msk [vmem:[#allocation3 + $0x8] sm:$0xff] %vm424_vm3, %v567_v27  ;;  %v688_v30 = vld [vmem:[%s686_s18 + $0x8] sm:$0xf]  ;;  %v687_v31 = vld [vmem:[%s686_s18] sm:$0xff]  ;;  %434 = vst.msk [vmem:[#allocation3] sm:$0xff] %vm424_vm3, %v431_v29  ;;  %s1160_s20 = sshll.u32 %s1159_s9, 4 }
 0x185   : > { %436 = vst.msk [vmem:[#allocation3 + $0x18] sm:$0xf] %vm362_vm1, %v432_v28  ;;  %690 = vst.msk [vmem:[#allocation3 + $0x28] sm:$0xf] %vm362_vm1, %v688_v30  ;;  %v608_v32 = vld [vmem:[%s606_s24 + $0x8] sm:$0xf] }
 0x186   : > { %689 = vst.msk [vmem:[#allocation3 + $0x10] sm:$0xff] %vm424_vm3, %v687_v31  ;;  %v607_v33 = vld [vmem:[%s606_s24] sm:$0xff]  ;;  %v478_v34 = vld [vmem:[%s476_s8 + $0x8] sm:$0xf]  ;;  %s1348_s18 = smov 80   ;;  %s512_s24 = scalar_lea.vmem [#allocation2], %s1160_s20 }
 0x187   : > { %597 = vrot.lane.b32.xlu1 %v592_v22, %s1345_s14  ;;  %595 = vrot.lane.b32.xlu0 %v591_v23, %s1345_s14  ;;  %v477_v35 = vld [vmem:[%s476_s8] sm:$0xff]  ;;  %v624_v36 = vld [vmem:[%s622_s13 + $0x8] sm:$0xf]  ;;  %s1178_s19 = sshll.u32 %s1177_s15, 4  ;;  %s1180_s8 = sshll.u32 %s1179_s21, 4  ;;  %vm559_vm1 = vcmask 1048448  }
 0x188   : > { %v623_v37 = vld [vmem:[%s622_s13] sm:$0xff]  ;;  %v496_v38 = vld [vmem:[%s494_s16 + $0x8] sm:$0xf]  ;;  %s654_s7 = scalar_lea.vmem [#allocation2], %s1178_s19  ;;  %s1163_s9 = sld [smem:[#allocation5 + $0x7]]  ;;  %vm1349_vm3 = vmmov 1  }
 0x189   : > { %v495_v39 = vld [vmem:[%s494_s16] sm:$0xff]  ;;  %v640_v40 = vld [vmem:[%s638_s22 + $0x8] sm:$0xf]  ;;  %s1184_s13 = sshll.u32 %s1183_s30, 4 }
 0x18a   : > { %v639_v41 = vld [vmem:[%s638_s22] sm:$0xff]  ;;  %v514_v42 = vld [vmem:[%s512_s24 + $0x8] sm:$0xf]  ;;  %s694_s15 = scalar_lea.vmem [#allocation2], %s1184_s13 }
 0x18b   : > { %465 = vrot.lane.b32.xlu1 %v460_v24, %s1345_s14  ;;  %463 = vrot.lane.b32.xlu0 %v459_v25, %s1345_s14  ;;  %s1347_s14 = smov 64   ;;  %v513_v43 = vld [vmem:[%s512_s24] sm:$0xff]  ;;  %v656_v44 = vld [vmem:[%s654_s7 + $0x8] sm:$0xf] }
 0x18c   : > { %v655_v45 = vld [vmem:[%s654_s7] sm:$0xff]  ;;  %v696_v50 = vld [vmem:[%s694_s15 + $0x8] sm:$0xf] }
 0x18d   : > { %v695_v51 = vld [vmem:[%s694_s15] sm:$0xff] }
 0x18e   : > { %s1164_s29 = sshll.u32 %s1163_s9, 4 }
 0x18f   : > { %613 = vrot.lane.b32.xlu1 %v608_v32, %s1346_s25  ;;  %611 = vrot.lane.b32.xlu0 %v607_v33, %s1346_s25  ;;  %s548_s16 = scalar_lea.vmem [#allocation2], %s1164_s29  ;;  %v1350_v32 = vmov 0  }
 0x190   : > { %v550_v52 = vld [vmem:[%s548_s16 + $0x8] sm:$0xf]  ;;  %v549_v53 = vld [vmem:[%s548_s16] sm:$0xff]  ;;  %1300 = vset.pattern.permute.xlu0 %v1350_v32  ;;  %1301 = vset.pattern.permute.xlu1 %v1350_v32 }
 0x193   : > { %483 = vrot.lane.b32.xlu1 %v478_v34, %s1346_s25  ;;  %481 = vrot.lane.b32.xlu0 %v477_v35, %s1346_s25  ;;  %s1162_s25 = sshll.u32 %s1161_s17, 4  ;;  %v707_v34 = vld [vmem:[%s1570_s3] sm:$0xff] }
 0x194   : > { %s530_s10 = scalar_lea.vmem [#allocation2], %s1162_s25  ;;  %v1000_v35 = vld [vmem:[%s1571_s4] sm:$0xff]  ;;  %s1199_s25 = sshll.u32 %s1581_s26, 4 }
 0x195   : > { %v532_v46 = vld [vmem:[%s530_s10 + $0x8] sm:$0xf]  ;;  %v531_v47 = vld [vmem:[%s530_s10] sm:$0xff] }
 0x197   : > { %629 = vrot.lane.b32.xlu1 %v624_v36, %s1347_s14  ;;  %627 = vrot.lane.b32.xlu0 %v623_v37, %s1347_s14  ;;  %v1008_v36 = vld [vmem:[%s1572_s5] sm:$0xff] }
 0x19b   : > { %501 = vrot.lane.b32.xlu1 %v496_v38, %s1347_s14  ;;  %499 = vrot.lane.b32.xlu0 %v495_v39, %s1347_s14  ;;  %s670_s14 = scalar_lea.vmem [#allocation2], %s1180_s8  ;;  %s253_s8 = scalar_lea.vmem %s1573_s6, %s1199_s25 }
 0x19c   : > { %v672_v48 = vld [vmem:[%s670_s14 + $0x8] sm:$0xf]  ;;  %v671_v49 = vld [vmem:[%s670_s14] sm:$0xff] }
 0x19f   : > { %645 = vrot.lane.b32.xlu1 %v640_v40, %s1348_s18  ;;  %643 = vrot.lane.b32.xlu0 %v639_v41, %s1348_s18 }
 0x1a3   : > { %519 = vrot.lane.b32.xlu1 %v514_v42, %s1348_s18  ;;  %517 = vrot.lane.b32.xlu0 %v513_v43, %s1348_s18 }
 0x1a7   : > { %661 = vrot.lane.b32.xlu1 %v656_v44, %s1343_s12  ;;  %659 = vrot.lane.b32.xlu0 %v655_v45, %s1343_s12 }
 0x1ab   : > { %537 = vrot.lane.b32.xlu1 %v532_v46, %s1343_s12  ;;  %535 = vrot.lane.b32.xlu0 %v531_v47, %s1343_s12 }
 0x1af   : > { %677 = vrot.lane.b32.xlu1 %v672_v48, %s1341_s11  ;;  %675 = vrot.lane.b32.xlu0 %v671_v49, %s1341_s11 }
 0x1b3   : > { %701 = vrot.lane.b32.xlu1 %v696_v50, %s1344_s23  ;;  %699 = vrot.lane.b32.xlu0 %v695_v51, %s1344_s23 }
 0x1b7   : > { %555 = vrot.lane.b32.xlu1 %v550_v52, %s1341_s11  ;;  %553 = vrot.lane.b32.xlu0 %v549_v53, %s1341_s11 }
 0x1f1   : > { %v582_v54 = vpop.permute.xlu1 %581  ;;  %v580_v55 = vpop.permute.xlu0 %579 }
 0x1f2   : > { %586 = vst.msk [vmem:[#allocation3 + $0x20] sm:$0xf] %vm453_vm4, %v582_v54 }
 0x1f3   : > { %585 = vst.msk [vmem:[#allocation3 + $0x8] sm:$0xff] %vm451_vm5, %v580_v55 }
 0x1f5   : > { %v448_v56 = vpop.permute.xlu1 %447  ;;  %v446_v57 = vpop.permute.xlu0 %445 }
 0x1f6   : > { %454 = vst.msk [vmem:[#allocation3 + $0x18] sm:$0xf] %vm453_vm4, %v448_v56 }
 0x1f7   : > { %452 = vst.msk [vmem:[#allocation3] sm:$0xff] %vm451_vm5, %v446_v57 }
 0x1f9   : > { %v598_v58 = vpop.permute.xlu1 %597  ;;  %v596_v59 = vpop.permute.xlu0 %595 }
 0x1fa   : > { %602 = vst.msk [vmem:[#allocation3 + $0x20] sm:$0xf] %vm471_vm6, %v598_v58 }
 0x1fb   : > { %601 = vst.msk [vmem:[#allocation3 + $0x8] sm:$0xff] %vm469_vm7, %v596_v59 }
 0x1fd   : > { %v466_v60 = vpop.permute.xlu1 %465  ;;  %v464_v61 = vpop.permute.xlu0 %463 }
 0x1fe   : > { %472 = vst.msk [vmem:[#allocation3 + $0x18] sm:$0xf] %vm471_vm6, %v466_v60  ;;  %vm1503_vm6 = vmpackc.low %vm745_vm2, %vm1349_vm3 }
 0x1ff   : > { %470 = vst.msk [vmem:[#allocation3] sm:$0xff] %vm469_vm7, %v464_v61  ;;  %vm913_vm7 = vcmask 785408  }
 0x201   : > { %v614_v62 = vpop.permute.xlu1 %613  ;;  %v612_v63 = vpop.permute.xlu0 %611 }
 0x202   : > { %618 = vst.msk [vmem:[#allocation3 + $0x20] sm:$0xf] %vm489_vm8, %v614_v62 }
 0x203   : > { %617 = vst.msk [vmem:[#allocation3 + $0x8] sm:$0xff] %vm487_vm9, %v612_v63 }
 0x205   : > { %v484_v0 = vpop.permute.xlu1 %483  ;;  %v482_v1 = vpop.permute.xlu0 %481 }
 0x206   : > { %490 = vst.msk [vmem:[#allocation3 + $0x18] sm:$0xf] %vm489_vm8, %v484_v0 }
 0x207   : > { %488 = vst.msk [vmem:[#allocation3] sm:$0xff] %vm487_vm9, %v482_v1 }
 0x209   : > { %v630_v2 = vpop.permute.xlu1 %629  ;;  %v628_v3 = vpop.permute.xlu0 %627 }
 0x20a   : > { %634 = vst.msk [vmem:[#allocation3 + $0x20] sm:$0xf] %vm507_vm10, %v630_v2  ;;  %v1185_v2 = vld [vmem:[%s1570_s3 + $0x8] sm:$0xff] }
 0x20b   : > { %633 = vst.msk [vmem:[#allocation3 + $0x8] sm:$0xff] %vm505_vm11, %v628_v3  ;;  %v1192_v3 = vld [vmem:[%s1570_s3 + $0x10] sm:$0xff] }
 0x20d   : > { %v502_v4 = vpop.permute.xlu1 %501  ;;  %v500_v5 = vpop.permute.xlu0 %499 }
 0x20e   : > { %508 = vst.msk [vmem:[#allocation3 + $0x18] sm:$0xf] %vm507_vm10, %v502_v4 }
 0x20f   : > { %506 = vst.msk [vmem:[#allocation3] sm:$0xff] %vm505_vm11, %v500_v5 }
 0x211   : > { %v646_v6 = vpop.permute.xlu1 %645  ;;  %v644_v8 = vpop.permute.xlu0 %643 }
 0x212   : > { %650 = vst.msk [vmem:[#allocation3 + $0x20] sm:$0xf] %vm525_vm12, %v646_v6 }
 0x213   : > { %649 = vst.msk [vmem:[#allocation3 + $0x8] sm:$0xff] %vm523_vm13, %v644_v8 }
 0x215   : > { %v520_v9 = vpop.permute.xlu1 %519  ;;  %v518_v10 = vpop.permute.xlu0 %517 }
 0x216   : > { %526 = vst.msk [vmem:[#allocation3 + $0x18] sm:$0xf] %vm525_vm12, %v520_v9 }
 0x217   : > { %524 = vst.msk [vmem:[#allocation3] sm:$0xff] %vm523_vm13, %v518_v10 }
 0x219   : > { %v662_v11 = vpop.permute.xlu1 %661  ;;  %v660_v12 = vpop.permute.xlu0 %659 }
 0x21a   : > { %666 = vst.msk [vmem:[#allocation3 + $0x20] sm:$0xf] %vm543_vm14, %v662_v11 }
 0x21b   : > { %665 = vst.msk [vmem:[#allocation3 + $0x8] sm:$0xff] %vm541_vm15, %v660_v12 }
 0x21d   : > { %v538_v13 = vpop.permute.xlu1 %537  ;;  %v536_v14 = vpop.permute.xlu0 %535 }
 0x21e   : > { %544 = vst.msk [vmem:[#allocation3 + $0x18] sm:$0xf] %vm543_vm14, %v538_v13 }
 0x21f   : > { %542 = vst.msk [vmem:[#allocation3] sm:$0xff] %vm541_vm15, %v536_v14 }
 0x221   : > { %v678_v15 = vpop.permute.xlu1 %677  ;;  %v676_v16 = vpop.permute.xlu0 %675 }
 0x222   : > { %682 = vst.msk [vmem:[#allocation3 + $0x20] sm:$0xf] %vm561_vm0, %v678_v15 }
 0x223   : > { %681 = vst.msk [vmem:[#allocation3 + $0x8] sm:$0xff] %vm559_vm1, %v676_v16 }
 0x225   : > { %v702_v17 = vpop.permute.xlu1 %701  ;;  %v700_v18 = vpop.permute.xlu0 %699 }
 0x226   : > { %706 = vst.msk [vmem:[#allocation3 + $0x28] sm:$0xf] %vm453_vm4, %v702_v17  ;;  %vm741_vm4 = vcmask 97280  }
 0x227   : > { %705 = vst.msk [vmem:[#allocation3 + $0x10] sm:$0xff] %vm451_vm5, %v700_v18  ;;  %vm734_vm5 = vcmask 916480  }
 0x229   : > { %v556_v19 = vpop.permute.xlu1 %555  ;;  %v554_v20 = vpop.permute.xlu0 %553  ;;  %v711_v22 = vld [vmem:[#allocation3 + $0x20] sm:$0xf] }
 0x22a   : > { %v709_v21 = vld [vmem:[#allocation3 + $0x8] sm:$0xff]  ;;  %562 = vst.msk [vmem:[#allocation3 + $0x18] sm:$0xf] %vm561_vm0, %v556_v19 }
 0x22b   : > { %560 = vst.msk [vmem:[#allocation3] sm:$0xff] %vm559_vm1, %v554_v20  ;;  %v1219_v24 = vpack.c.bf16 %v711_v22, %v709_v21 }
 0x22d   : > { %1221 = vmatprep.subr.msk.bf16.mxu1 %vm1503_vm6, %v1219_v24  ;;  %v715_v25 = vld [vmem:[#allocation3 + $0x28] sm:$0xf] }
 0x22e   : > { %v714_v26 = vld [vmem:[#allocation3 + $0x10] sm:$0xff]  ;;  %v1275_v27 = vpack.i.bf16 %v715_v25, %v711_v22 }
 0x22f   : > { %v1270_v28 = vpack.i.bf16 %v714_v26, %v709_v21 }
 0x230   : > { %1276 = vrot.lane.b32.xlu1 %v1275_v27, %s1341_s11 }
 0x231   : > { %1271 = vrot.lane.b32.xlu0 %v1270_v28, %s1341_s11  ;;  %v710_v30 = vld [vmem:[#allocation3 + $0x18] sm:$0xf] }
 0x232   : > { %v708_v29 = vld [vmem:[#allocation3] sm:$0xff] }
 0x233   : > { %v1222_v31 = vpack.c.bf16 %v710_v30, %v708_v29  ;;  %v1295_v33 = vpack.i.bf16 %v710_v30, %v708_v29 }
 0x234   : > { %1286 = vrot.lane.b32.xlu1 %v1275_v27, %s1343_s12 }
 0x235   : > { %1281 = vrot.lane.b32.xlu0 %v1270_v28, %s1343_s12  ;;  %1224 = vmatpush1.bf16.msk.msra.mxu1 %vm1503_vm6, %v1222_v31 }
 0x238   : > { %1296 = vrot.lane.b32.xlu1 %v1295_v33, %s1343_s12  ;;  %1191 = vmatmul.mubr.msk.f32.vlgmr.msra.gmra.mrb[0].mxu1 %vm741_vm4, %v707_v34 }
 0x239   : > { %1291 = vrot.lane.b32.xlu0 %v1295_v33, %s1341_s11  ;;  %991 = vmatprep.mubr.f32.mxu1 %v1342_v7 }
 0x23c   : > { %1011 = vperm.xlu1 %1301, %v1008_v36  }
 0x23d   : > { %1003 = vperm.xlu0 %1300, %v1000_v35  }
 0x2a2   : > { %v1277_v37 = vpop.permute.xlu1 %1276 }
 0x2a3   : > { %v1272_v38 = vpop.permute.xlu0 %1271  ;;  %v1279_v39 = vunpack.i.h.bf16 %v1277_v37  ;;  %v1278_v40 = vunpack.i.l.bf16 %v1277_v37 }
 0x2a4   : > { %v1274_v41 = vunpack.i.h.bf16 %v1272_v38  ;;  %v1273_v42 = vunpack.i.l.bf16 %v1272_v38 }
 0x2a5   : > { %v738_v43 = vsel %vm734_vm5, %v1278_v40, %v1279_v39 }
 0x2a6   : > { %v736_v44 = vsel %vm734_vm5, %v1273_v42, %v1274_v41  ;;  %v1287_v46 = vpop.permute.xlu1 %1286 }
 0x2a7   : > { %v1213_v45 = vpack.c.bf16 %v738_v43, %v736_v44  ;;  %v1282_v47 = vpop.permute.xlu0 %1281  ;;  %v1289_v48 = vunpack.i.h.bf16 %v1287_v46  ;;  %v1288_v49 = vunpack.i.l.bf16 %v1287_v46 }
 0x2a8   : > { %v1284_v7 = vunpack.i.h.bf16 %v1282_v47  ;;  %v1283_v50 = vunpack.i.l.bf16 %v1282_v47 }
 0x2a9   : > { %1215 = vmatprep.subr.msk.bf16.mxu0 %vm1503_vm6, %v1213_v45  ;;  %v917_v51 = vsel %vm913_vm7, %v1288_v49, %v1289_v48 }
 0x2aa   : > { %v915_v52 = vsel %vm913_vm7, %v1283_v50, %v1284_v7  ;;  %v1297_v54 = vpop.permute.xlu1 %1296 }
 0x2ab   : > { %v1225_v53 = vpack.c.bf16 %v917_v51, %v915_v52  ;;  %v1292_v55 = vpop.permute.xlu0 %1291  ;;  %v1299_v56 = vunpack.i.h.bf16 %v1297_v54  ;;  %v1298_v57 = vunpack.i.l.bf16 %v1297_v54 }
 0x2ac   : > { %v1294_v58 = vunpack.i.h.bf16 %v1292_v55  ;;  %v1293_v59 = vunpack.i.l.bf16 %v1292_v55 }
 0x2ad   : > { %1227 = vmatprep.subr.msk.bf16.mxu1 %vm1503_vm6, %v1225_v53  ;;  %v916_v60 = vsel %vm913_vm7, %v1299_v56, %v1288_v49  ;;  %v914_v61 = vsel %vm913_vm7, %v1298_v57, %v1283_v50 }
 0x2ae   : > { %v737_v62 = vsel %vm734_vm5, %v1294_v58, %v1278_v40  ;;  %v735_v63 = vsel %vm734_vm5, %v1293_v59, %v1273_v42  ;;  %v1228_v0 = vpack.c.bf16 %v916_v60, %v914_v61 }
 0x2af   : > { %v1216_v1 = vpack.c.bf16 %v737_v62, %v735_v63 }
 0x2b0   : > { %1230 = vmatpush1.bf16.msk.msra.mxu1 %vm1503_vm6, %v1228_v0 }
 0x2b1   : > { %1218 = vmatpush1.bf16.msk.msra.mxu0 %vm1503_vm6, %v1216_v1 }
 0x2b3   : > { %1195 = vmatmul.mubr.msk.f32.vlgmr.msra.gmra.mrb[0].mxu1 %vm741_vm4, %v1192_v3 }
 0x2b4   : > { %1188 = vmatmul.mubr.msk.f32.vlgmr.msra.gmra.mrb[4].mxu0 %vm741_vm4, %v1185_v2 }
 0x2bb   : > { %v1012_v12 = vpop.permute.xlu1 %1011 }
 0x2bc   : > { %v1004_v4 = vpop.permute.xlu0 %1003 }
 0x386   : > { %v993_v6 = vpop.f32.mrb[0].mxu1 }
 0x387   : > { %v816_v5 = vpop.f32.mrb[4].mxu0  ;;  %v995_v10 = vpop.f32.mrb[1].mxu1 }
 0x388   : > { %v1231_v8 = vadd.f32 %v993_v6, %v816_v5  ;;  %v818_v9 = vpop.f32.mrb[5].mxu0 }
 0x389   : > { %v1232_v11 = vadd.f32 %v995_v10, %v818_v9 }
 0x38a   : > { %v1006_v13 = vmul.f32 %v1231_v8, %v1004_v4 }
 0x38b   : > { %v1007_v14 = vmul.f32 %v1232_v11, %v1004_v4 }
 0x38c   : > { %v1014_v15 = vadd.f32 %v1012_v12, %v1006_v13 }
 0x38d   : > { %v1015_v16 = vadd.f32 %v1012_v12, %v1007_v14 }
 0x38e   : > { %v1016_v17 = vmax.f32 %v1014_v15, 0.0 }
 0x38f   : > { %v1017_v18 = vmax.f32 %v1015_v16, 0.0 }
 0x390   : > { %1018 = vst [vmem:[%s253_s8] sm:$0xff] %v1016_v17 }
 0x391   : > { %1019 = vst [vmem:[%s253_s8 + $0x8] sm:$0xff] %v1017_v18 }
 0x392 PF: > { %s22_s28 = sadd.s32 1, %s1338_s28   ;;  %s1576_s26 = smov %s1334_s27 }
 0x393   : > { %p19_p10 = scmp.ge.s32.totalorder %s22_s28, 4   ;;  %s1577_s27 = smov %s1579_s0 }
 0x395   :  { %21 = sbr.rel (!%p19_p10) target bundleno = 17 (0x11), region = 102 }

</bundles_post_ra>
